<compile_context>
chip_gen: v7x
topology: tpu7x:2x2x1
jax: 0.10.0
libtpu: 0.0.40
codegen_flags: <defaults>
</compile_context>

<pallas_src>
import jax
import jax.numpy as jnp
import numpy as np
from jax import lax
from jax.experimental import pallas as pl
from jax.experimental.pallas import tpu as pltpu


# ----------------------------------------------------------------------------
# Fused Pallas kernel: all LSTM layers + FC head in one invocation (no grid).
# ----------------------------------------------------------------------------
def make_lstm_model_kernel(T, B, H, O, num_layers):
    TB = T * B

    def kernel(*refs):
        # ---- unpack refs: inputs..., outputs..., scratch... -----------------
        n_in = 1 + 3 * num_layers + 2
        in_refs = refs[:n_in]
        out_ref, hn_ref, cn_ref = refs[n_in:n_in + 3]
        ybuf_ref, gbuf_ref = refs[n_in + 3], refs[n_in + 4]

        x_ref = in_refs[0]                                    # (T*B, D_in)
        layer_refs = [tuple(in_refs[1 + 3 * l: 4 + 3 * l])
                      for l in range(num_layers)]             # (wih_t, whh_t, b)
        fcw_ref, fcb_ref = in_refs[1 + 3 * num_layers:]       # (H, O), (1, O)

        h_last = None
        for l, (wih_ref, whh_ref, b_ref) in enumerate(layer_refs):
            last_layer = (l == num_layers - 1)

            # Layer input sequence, flattened time-major: (T*B, D_l)
            if l == 0:
                x_seq = x_ref[...]
            else:
                x_seq = ybuf_ref[...]

            # One big MXU matmul for the whole sequence's input projection,
            # with bias folded in (broadcast once per layer, not per step).
            gbuf_ref[...] = (
                jnp.dot(x_seq, wih_ref[...],
                        preferred_element_type=jnp.float32)
                + b_ref[...])                                  # (T*B, 4H)

            whh = whh_ref[...]                                 # (H, 4H), loaded once

            def step(t, carry):
                h, c = carry
                gates = gbuf_ref[pl.ds(t * B, B), :] + jnp.dot(
                    h, whh, preferred_element_type=jnp.float32)  # (B, 4H)
                i_g = jax.nn.sigmoid(gates[:, 0 * H:1 * H])
                f_g = jax.nn.sigmoid(gates[:, 1 * H:2 * H])
                g_g = jnp.tanh(gates[:, 2 * H:3 * H])
                o_g = jax.nn.sigmoid(gates[:, 3 * H:4 * H])
                c_new = f_g * c + i_g * g_g
                h_new = o_g * jnp.tanh(c_new)
                if not last_layer:
                    # Store this step's hidden as input for the next layer.
                    ybuf_ref[pl.ds(t * B, B), :] = h_new
                return (h_new, c_new)

            h0 = jnp.zeros((B, H), jnp.float32)
            c0 = jnp.zeros((B, H), jnp.float32)
            hT, cT = lax.fori_loop(0, T, step, (h0, c0), unroll=True)

            hn_ref[l, :, :] = hT
            cn_ref[l, :, :] = cT
            h_last = hT

        # Fused FC head on the last layer's final hidden state.
        out_ref[...] = (jnp.dot(h_last, fcw_ref[...],
                                preferred_element_type=jnp.float32)
                        + fcb_ref[...]).astype(out_ref.dtype)

    return kernel


# ----------------------------------------------------------------------------
# Wrappers
# ----------------------------------------------------------------------------
def prepare_params(layer_params, fc_w, fc_b):
    """One-time weight preprocessing (transposes / bias fold), outside forward."""
    prepped = []
    for (wih, whh, bih, bhh) in layer_params:
        prepped.append((jnp.transpose(wih),              # (D_in, 4H)
                        jnp.transpose(whh),              # (H, 4H)
                        (bih + bhh).reshape(1, -1)))     # (1, 4H)
    return tuple(prepped), jnp.transpose(fc_w), fc_b.reshape(1, -1)


@jax.jit
def lstm_model_forward(x_btd, prepped_layers, fc_w_t, fc_b_2d):
    """Full model forward matching the PyTorch module (eval semantics).

    x_btd: (B, T, D_in) batch_first.  Returns (out:(B,O), (hn:(L,B,H), cn:(L,B,H))).
    """
    # TODO(synk): nn.LSTM inter-layer dropout is only active in training mode;
    # inference (identity) semantics are implemented here.
    B, T, D = x_btd.shape
    H = prepped_layers[0][1].shape[0]
    O = fc_w_t.shape[1]
    L = len(prepped_layers)

    # Time-major, flattened (T*B, D) slab — the kernel's layer-0 input.
    x_flat = jnp.swapaxes(x_btd, 0, 1).reshape(T * B, D)

    flat_w = []
    for (wih_t, whh_t, bias) in prepped_layers:
        flat_w += [wih_t, whh_t, bias]

    out, hn, cn = pl.pallas_call(
        make_lstm_model_kernel(T, B, H, O, L),
        out_shape=(jax.ShapeDtypeStruct((B, O), jnp.float32),
                   jax.ShapeDtypeStruct((L, B, H), jnp.float32),
                   jax.ShapeDtypeStruct((L, B, H), jnp.float32)),
        scratch_shapes=[pltpu.VMEM((T * B, H), jnp.float32),      # inter-layer seq
                        pltpu.VMEM((T * B, 4 * H), jnp.float32)],  # input projection
    )(x_flat, *flat_w, fc_w_t, fc_b_2d)
    return out, (hn, cn)


# ----------------------------------------------------------------------------
# Pure-JAX reference (mirrors nn.LSTM batch_first + nn.Linear, eval mode)
# ----------------------------------------------------------------------------
def lstm_ref(x_btd, layer_params, fc_w, fc_b):
    B = x_btd.shape[0]
    inp = x_btd
    hns, cns = [], []
    for (wih, whh, bih, bhh) in layer_params:
        H = whh.shape[1]

        def step(carry, x_t):
            h, c = carry
            gates = x_t @ wih.T + h @ whh.T + bih + bhh
            i, f, g, o = jnp.split(gates, 4, axis=-1)
            i, f, o = jax.nn.sigmoid(i), jax.nn.sigmoid(f), jax.nn.sigmoid(o)
            g = jnp.tanh(g)
            c = f * c + i * g
            h = o * jnp.tanh(c)
            return (h, c), h

        init = (jnp.zeros((B, H), jnp.float32), jnp.zeros((B, H), jnp.float32))
        (hT, cT), ys = jax.lax.scan(step, init, jnp.swapaxes(inp, 0, 1))
        inp = jnp.swapaxes(ys, 0, 1)
        hns.append(hT)
        cns.append(cT)
    out = inp[:, -1, :] @ fc_w.T + fc_b
    return out, (jnp.stack(hns), jnp.stack(cns))


# ----------------------------------------------------------------------------
if __name__ == "__main__":
    # Model config (matches the PyTorch module's __init__ shapes)
    input_size, hidden_size, num_layers, output_size = 4, 32, 2, 1
    B, T = 2, 8

    key = jax.random.PRNGKey(0)
    keys = jax.random.split(key, 4 * num_layers + 3)
    scale = 1.0 / np.sqrt(hidden_size)

    layer_params = []
    k_idx = 0
    for layer in range(num_layers):
        d_in = input_size if layer == 0 else hidden_size
        wih = jax.random.uniform(keys[k_idx], (4 * hidden_size, d_in),
                                 jnp.float32, -scale, scale); k_idx += 1
        whh = jax.random.uniform(keys[k_idx], (4 * hidden_size, hidden_size),
                                 jnp.float32, -scale, scale); k_idx += 1
        bih = jax.random.uniform(keys[k_idx], (4 * hidden_size,),
                                 jnp.float32, -scale, scale); k_idx += 1
        bhh = jax.random.uniform(keys[k_idx], (4 * hidden_size,),
                                 jnp.float32, -scale, scale); k_idx += 1
        layer_params.append((wih, whh, bih, bhh))

    fc_w = jax.random.uniform(keys[k_idx], (output_size, hidden_size),
                              jnp.float32, -scale, scale); k_idx += 1
    fc_b = jax.random.uniform(keys[k_idx], (output_size,),
                              jnp.float32, -scale, scale); k_idx += 1

    x = jax.random.normal(keys[k_idx], (B, T, input_size), jnp.float32)

    # One-time weight preprocessing (transposes / bias folds) outside forward.
    prepped_layers, fc_w_t, fc_b_2d = prepare_params(layer_params, fc_w, fc_b)

    out, (hn, cn) = lstm_model_forward(x, prepped_layers, fc_w_t, fc_b_2d)
    jax.block_until_ready(out)
    jax.block_until_ready(hn)
    jax.block_until_ready(cn)

    out_r, (hn_r, cn_r) = lstm_ref(x, layer_params, fc_w, fc_b)
    np.testing.assert_allclose(np.asarray(out), np.asarray(out_r),
                               rtol=1e-5, atol=1e-5)
    np.testing.assert_allclose(np.asarray(hn), np.asarray(hn_r),
                               rtol=1e-5, atol=1e-5)
    np.testing.assert_allclose(np.asarray(cn), np.asarray(cn_r),
                               rtol=1e-5, atol=1e-5)

    assert out.shape == (B, output_size)
    assert hn.shape == (num_layers, B, hidden_size)
    assert cn.shape == (num_layers, B, hidden_size)
    print("KERNEL_OK")
</pallas_src>

<mosaic_0001>
module attributes {stable_mosaic.version = 11 : i64} {
  func.func @kernel(%arg0: memref<16x4xf32, #tpu.memory_space<vmem>>, %arg1: memref<4x128xf32, #tpu.memory_space<vmem>>, %arg2: memref<32x128xf32, #tpu.memory_space<vmem>>, %arg3: memref<1x128xf32, #tpu.memory_space<vmem>>, %arg4: memref<32x128xf32, #tpu.memory_space<vmem>>, %arg5: memref<32x128xf32, #tpu.memory_space<vmem>>, %arg6: memref<1x128xf32, #tpu.memory_space<vmem>>, %arg7: memref<32x1xf32, #tpu.memory_space<vmem>>, %arg8: memref<1x1xf32, #tpu.memory_space<vmem>>, %arg9: memref<2x1xf32, #tpu.memory_space<vmem>>, %arg10: memref<2x2x32xf32, #tpu.memory_space<vmem>>, %arg11: memref<2x2x32xf32, #tpu.memory_space<vmem>>, %arg12: memref<16x32xf32, #tpu.memory_space<vmem>>, %arg13: memref<16x128xf32, #tpu.memory_space<vmem>>) attributes {dimension_semantics = [], scalar_prefetch = 0 : i64, scratch_operands = 2 : i64, tpu.core_type = #tpu.core_type<tc>} {
    %c0 = arith.constant 0 : index
    %c0_0 = arith.constant 0 : index
    %0 = vector.load %arg0[%c0, %c0_0] : memref<16x4xf32, #tpu.memory_space<vmem>>, vector<16x4xf32>
    %c0_1 = arith.constant 0 : index
    %c0_2 = arith.constant 0 : index
    %1 = vector.load %arg1[%c0_1, %c0_2] : memref<4x128xf32, #tpu.memory_space<vmem>>, vector<4x128xf32>
    %cst = arith.constant dense<0.000000e+00> : vector<16x128xf32>
    %2 = tpu.matmul %0, %1, %cst {dimension_numbers = #tpu.dot_dimension_numbers<[1], [0], [0], [1], [0, 0, 1, 1], [], []>} : vector<16x4xf32>, vector<4x128xf32>, vector<16x128xf32> -> vector<16x128xf32>
    %c0_3 = arith.constant 0 : index
    %c0_4 = arith.constant 0 : index
    %3 = vector.load %arg3[%c0_3, %c0_4] : memref<1x128xf32, #tpu.memory_space<vmem>>, vector<1x128xf32>
    %4 = vector.broadcast %3 : vector<1x128xf32> to vector<16x128xf32>
    %5 = arith.addf %2, %4 : vector<16x128xf32>
    %c0_5 = arith.constant 0 : index
    %c0_6 = arith.constant 0 : index
    %6 = vector.load %arg13[%c0_5, %c0_6] : memref<16x128xf32, #tpu.memory_space<vmem>>, vector<16x128xf32>
    tpu.vector_store %arg13[%c0_5, %c0_6], %5 {strides = array<i32>} : memref<16x128xf32, #tpu.memory_space<vmem>>, vector<16x128xf32>,
    %c0_7 = arith.constant 0 : index
    %c0_8 = arith.constant 0 : index
    %7 = vector.load %arg2[%c0_7, %c0_8] : memref<32x128xf32, #tpu.memory_space<vmem>>, vector<32x128xf32>
    %cst_9 = arith.constant 0.000000e+00 : f32
    %8 = vector.broadcast %cst_9 : f32 to vector<2x32xf32>
    %cst_10 = arith.constant 0.000000e+00 : f32
    %9 = vector.broadcast %cst_10 : f32 to vector<2x32xf32>
    %c0_i32 = arith.constant 0 : i32
    %c2_i32 = arith.constant 2 : i32
    %10 = arith.muli %c0_i32, %c2_i32 : i32
    %11 = arith.index_cast %10 : i32 to index
    %c0_11 = arith.constant 0 : index
    %12 = vector.load %arg13[%11, %c0_11] : memref<16x128xf32, #tpu.memory_space<vmem>>, vector<2x128xf32>
    %cst_12 = arith.constant dense<0.000000e+00> : vector<2x128xf32>
    %13 = tpu.matmul %8, %7, %cst_12 {dimension_numbers = #tpu.dot_dimension_numbers<[1], [0], [0], [1], [0, 0, 1, 1], [], []>} : vector<2x32xf32>, vector<32x128xf32>, vector<2x128xf32> -> vector<2x128xf32>
    %14 = arith.addf %12, %13 : vector<2x128xf32>
    %15 = vector.extract_strided_slice %14 {offsets = [0, 0], sizes = [2, 32], strides = [1, 1]} : vector<2x128xf32> to vector<2x32xf32>
    %16 = arith.negf %15 : vector<2x32xf32>
    %17 = math.exp %16 : vector<2x32xf32>
    %cst_13 = arith.constant 1.000000e+00 : f32
    %18 = vector.broadcast %cst_13 : f32 to vector<2x32xf32>
    %19 = arith.addf %18, %17 : vector<2x32xf32>
    %20 = arith.divf %18, %19 : vector<2x32xf32>
    %21 = vector.extract_strided_slice %14 {offsets = [0, 32], sizes = [2, 32], strides = [1, 1]} : vector<2x128xf32> to vector<2x32xf32>
    %22 = arith.negf %21 : vector<2x32xf32>
    %23 = math.exp %22 : vector<2x32xf32>
    %cst_14 = arith.constant 1.000000e+00 : f32
    %24 = vector.broadcast %cst_14 : f32 to vector<2x32xf32>
    %25 = arith.addf %24, %23 : vector<2x32xf32>
    %26 = arith.divf %24, %25 : vector<2x32xf32>
    %27 = vector.extract_strided_slice %14 {offsets = [0, 64], sizes = [2, 32], strides = [1, 1]} : vector<2x128xf32> to vector<2x32xf32>
    %28 = math.tanh %27 : vector<2x32xf32>
    %29 = vector.extract_strided_slice %14 {offsets = [0, 96], sizes = [2, 32], strides = [1, 1]} : vector<2x128xf32> to vector<2x32xf32>
    %30 = arith.negf %29 : vector<2x32xf32>
    %31 = math.exp %30 : vector<2x32xf32>
    %cst_15 = arith.constant 1.000000e+00 : f32
    %32 = vector.broadcast %cst_15 : f32 to vector<2x32xf32>
    %33 = arith.addf %32, %31 : vector<2x32xf32>
    %34 = arith.divf %32, %33 : vector<2x32xf32>
    %35 = arith.mulf %26, %9 : vector<2x32xf32>
    %36 = arith.mulf %20, %28 : vector<2x32xf32>
    %37 = arith.addf %35, %36 : vector<2x32xf32>
    %38 = math.tanh %37 : vector<2x32xf32>
    %39 = arith.mulf %34, %38 : vector<2x32xf32>
    %c2_i32_16 = arith.constant 2 : i32
    %40 = arith.muli %c0_i32, %c2_i32_16 : i32
    %41 = arith.index_cast %40 : i32 to index
    %c0_17 = arith.constant 0 : index
    %42 = vector.load %arg12[%41, %c0_17] : memref<16x32xf32, #tpu.memory_space<vmem>>, vector<2x32xf32>
    tpu.vector_store %arg12[%41, %c0_17], %39 {strides = array<i32>} : memref<16x32xf32, #tpu.memory_space<vmem>>, vector<2x32xf32>,
    %c1_i32 = arith.constant 1 : i32
    %c2_i32_18 = arith.constant 2 : i32
    %43 = arith.muli %c1_i32, %c2_i32_18 : i32
    %44 = arith.index_cast %43 : i32 to index
    %c0_19 = arith.constant 0 : index
    %45 = vector.load %arg13[%44, %c0_19] : memref<16x128xf32, #tpu.memory_space<vmem>>, vector<2x128xf32>
    %cst_20 = arith.constant dense<0.000000e+00> : vector<2x128xf32>
    %46 = tpu.matmul %39, %7, %cst_20 {dimension_numbers = #tpu.dot_dimension_numbers<[1], [0], [0], [1], [0, 0, 1, 1], [], []>} : vector<2x32xf32>, vector<32x128xf32>, vector<2x128xf32> -> vector<2x128xf32>
    %47 = arith.addf %45, %46 : vector<2x128xf32>
    %48 = vector.extract_strided_slice %47 {offsets = [0, 0], sizes = [2, 32], strides = [1, 1]} : vector<2x128xf32> to vector<2x32xf32>
    %49 = arith.negf %48 : vector<2x32xf32>
    %50 = math.exp %49 : vector<2x32xf32>
    %cst_21 = arith.constant 1.000000e+00 : f32
    %51 = vector.broadcast %cst_21 : f32 to vector<2x32xf32>
    %52 = arith.addf %51, %50 : vector<2x32xf32>
    %53 = arith.divf %51, %52 : vector<2x32xf32>
    %54 = vector.extract_strided_slice %47 {offsets = [0, 32], sizes = [2, 32], strides = [1, 1]} : vector<2x128xf32> to vector<2x32xf32>
    %55 = arith.negf %54 : vector<2x32xf32>
    %56 = math.exp %55 : vector<2x32xf32>
    %cst_22 = arith.constant 1.000000e+00 : f32
    %57 = vector.broadcast %cst_22 : f32 to vector<2x32xf32>
    %58 = arith.addf %57, %56 : vector<2x32xf32>
    %59 = arith.divf %57, %58 : vector<2x32xf32>
    %60 = vector.extract_strided_slice %47 {offsets = [0, 64], sizes = [2, 32], strides = [1, 1]} : vector<2x128xf32> to vector<2x32xf32>
    %61 = math.tanh %60 : vector<2x32xf32>
    %62 = vector.extract_strided_slice %47 {offsets = [0, 96], sizes = [2, 32], strides = [1, 1]} : vector<2x128xf32> to vector<2x32xf32>
    %63 = arith.negf %62 : vector<2x32xf32>
    %64 = math.exp %63 : vector<2x32xf32>
    %cst_23 = arith.constant 1.000000e+00 : f32
    %65 = vector.broadcast %cst_23 : f32 to vector<2x32xf32>
    %66 = arith.addf %65, %64 : vector<2x32xf32>
    %67 = arith.divf %65, %66 : vector<2x32xf32>
    %68 = arith.mulf %59, %37 : vector<2x32xf32>
    %69 = arith.mulf %53, %61 : vector<2x32xf32>
    %70 = arith.addf %68, %69 : vector<2x32xf32>
    %71 = math.tanh %70 : vector<2x32xf32>
    %72 = arith.mulf %67, %71 : vector<2x32xf32>
    %c2_i32_24 = arith.constant 2 : i32
    %73 = arith.muli %c1_i32, %c2_i32_24 : i32
    %74 = arith.index_cast %73 : i32 to index
    %c0_25 = arith.constant 0 : index
    %75 = vector.load %arg12[%74, %c0_25] : memref<16x32xf32, #tpu.memory_space<vmem>>, vector<2x32xf32>
    tpu.vector_store %arg12[%74, %c0_25], %72 {strides = array<i32>} : memref<16x32xf32, #tpu.memory_space<vmem>>, vector<2x32xf32>,
    %c2_i32_26 = arith.constant 2 : i32
    %c2_i32_27 = arith.constant 2 : i32
    %76 = arith.muli %c2_i32_26, %c2_i32_27 : i32
    %77 = arith.index_cast %76 : i32 to index
    %c0_28 = arith.constant 0 : index
    %78 = vector.load %arg13[%77, %c0_28] : memref<16x128xf32, #tpu.memory_space<vmem>>, vector<2x128xf32>
    %cst_29 = arith.constant dense<0.000000e+00> : vector<2x128xf32>
    %79 = tpu.matmul %72, %7, %cst_29 {dimension_numbers = #tpu.dot_dimension_numbers<[1], [0], [0], [1], [0, 0, 1, 1], [], []>} : vector<2x32xf32>, vector<32x128xf32>, vector<2x128xf32> -> vector<2x128xf32>
    %80 = arith.addf %78, %79 : vector<2x128xf32>
    %81 = vector.extract_strided_slice %80 {offsets = [0, 0], sizes = [2, 32], strides = [1, 1]} : vector<2x128xf32> to vector<2x32xf32>
    %82 = arith.negf %81 : vector<2x32xf32>
    %83 = math.exp %82 : vector<2x32xf32>
    %cst_30 = arith.constant 1.000000e+00 : f32
    %84 = vector.broadcast %cst_30 : f32 to vector<2x32xf32>
    %85 = arith.addf %84, %83 : vector<2x32xf32>
    %86 = arith.divf %84, %85 : vector<2x32xf32>
    %87 = vector.extract_strided_slice %80 {offsets = [0, 32], sizes = [2, 32], strides = [1, 1]} : vector<2x128xf32> to vector<2x32xf32>
    %88 = arith.negf %87 : vector<2x32xf32>
    %89 = math.exp %88 : vector<2x32xf32>
    %cst_31 = arith.constant 1.000000e+00 : f32
    %90 = vector.broadcast %cst_31 : f32 to vector<2x32xf32>
    %91 = arith.addf %90, %89 : vector<2x32xf32>
    %92 = arith.divf %90, %91 : vector<2x32xf32>
    %93 = vector.extract_strided_slice %80 {offsets = [0, 64], sizes = [2, 32], strides = [1, 1]} : vector<2x128xf32> to vector<2x32xf32>
    %94 = math.tanh %93 : vector<2x32xf32>
    %95 = vector.extract_strided_slice %80 {offsets = [0, 96], sizes = [2, 32], strides = [1, 1]} : vector<2x128xf32> to vector<2x32xf32>
    %96 = arith.negf %95 : vector<2x32xf32>
    %97 = math.exp %96 : vector<2x32xf32>
    %cst_32 = arith.constant 1.000000e+00 : f32
    %98 = vector.broadcast %cst_32 : f32 to vector<2x32xf32>
    %99 = arith.addf %98, %97 : vector<2x32xf32>
    %100 = arith.divf %98, %99 : vector<2x32xf32>
    %101 = arith.mulf %92, %70 : vector<2x32xf32>
    %102 = arith.mulf %86, %94 : vector<2x32xf32>
    %103 = arith.addf %101, %102 : vector<2x32xf32>
    %104 = math.tanh %103 : vector<2x32xf32>
    %105 = arith.mulf %100, %104 : vector<2x32xf32>
    %c2_i32_33 = arith.constant 2 : i32
    %106 = arith.muli %c2_i32_26, %c2_i32_33 : i32
    %107 = arith.index_cast %106 : i32 to index
    %c0_34 = arith.constant 0 : index
    %108 = vector.load %arg12[%107, %c0_34] : memref<16x32xf32, #tpu.memory_space<vmem>>, vector<2x32xf32>
    tpu.vector_store %arg12[%107, %c0_34], %105 {strides = array<i32>} : memref<16x32xf32, #tpu.memory_space<vmem>>, vector<2x32xf32>,
    %c3_i32 = arith.constant 3 : i32
    %c2_i32_35 = arith.constant 2 : i32
    %109 = arith.muli %c3_i32, %c2_i32_35 : i32
    %110 = arith.index_cast %109 : i32 to index
    %c0_36 = arith.constant 0 : index
    %111 = vector.load %arg13[%110, %c0_36] : memref<16x128xf32, #tpu.memory_space<vmem>>, vector<2x128xf32>
    %cst_37 = arith.constant dense<0.000000e+00> : vector<2x128xf32>
    %112 = tpu.matmul %105, %7, %cst_37 {dimension_numbers = #tpu.dot_dimension_numbers<[1], [0], [0], [1], [0, 0, 1, 1], [], []>} : vector<2x32xf32>, vector<32x128xf32>, vector<2x128xf32> -> vector<2x128xf32>
    %113 = arith.addf %111, %112 : vector<2x128xf32>
    %114 = vector.extract_strided_slice %113 {offsets = [0, 0], sizes = [2, 32], strides = [1, 1]} : vector<2x128xf32> to vector<2x32xf32>
    %115 = arith.negf %114 : vector<2x32xf32>
    %116 = math.exp %115 : vector<2x32xf32>
    %cst_38 = arith.constant 1.000000e+00 : f32
    %117 = vector.broadcast %cst_38 : f32 to vector<2x32xf32>
    %118 = arith.addf %117, %116 : vector<2x32xf32>
    %119 = arith.divf %117, %118 : vector<2x32xf32>
    %120 = vector.extract_strided_slice %113 {offsets = [0, 32], sizes = [2, 32], strides = [1, 1]} : vector<2x128xf32> to vector<2x32xf32>
    %121 = arith.negf %120 : vector<2x32xf32>
    %122 = math.exp %121 : vector<2x32xf32>
    %cst_39 = arith.constant 1.000000e+00 : f32
    %123 = vector.broadcast %cst_39 : f32 to vector<2x32xf32>
    %124 = arith.addf %123, %122 : vector<2x32xf32>
    %125 = arith.divf %123, %124 : vector<2x32xf32>
    %126 = vector.extract_strided_slice %113 {offsets = [0, 64], sizes = [2, 32], strides = [1, 1]} : vector<2x128xf32> to vector<2x32xf32>
    %127 = math.tanh %126 : vector<2x32xf32>
    %128 = vector.extract_strided_slice %113 {offsets = [0, 96], sizes = [2, 32], strides = [1, 1]} : vector<2x128xf32> to vector<2x32xf32>
    %129 = arith.negf %128 : vector<2x32xf32>
    %130 = math.exp %129 : vector<2x32xf32>
    %cst_40 = arith.constant 1.000000e+00 : f32
    %131 = vector.broadcast %cst_40 : f32 to vector<2x32xf32>
    %132 = arith.addf %131, %130 : vector<2x32xf32>
    %133 = arith.divf %131, %132 : vector<2x32xf32>
    %134 = arith.mulf %125, %103 : vector<2x32xf32>
    %135 = arith.mulf %119, %127 : vector<2x32xf32>
    %136 = arith.addf %134, %135 : vector<2x32xf32>
    %137 = math.tanh %136 : vector<2x32xf32>
    %138 = arith.mulf %133, %137 : vector<2x32xf32>
    %c2_i32_41 = arith.constant 2 : i32
    %139 = arith.muli %c3_i32, %c2_i32_41 : i32
    %140 = arith.index_cast %139 : i32 to index
    %c0_42 = arith.constant 0 : index
    %141 = vector.load %arg12[%140, %c0_42] : memref<16x32xf32, #tpu.memory_space<vmem>>, vector<2x32xf32>
    tpu.vector_store %arg12[%140, %c0_42], %138 {strides = array<i32>} : memref<16x32xf32, #tpu.memory_space<vmem>>, vector<2x32xf32>,
    %c4_i32 = arith.constant 4 : i32
    %c2_i32_43 = arith.constant 2 : i32
    %142 = arith.muli %c4_i32, %c2_i32_43 : i32
    %143 = arith.index_cast %142 : i32 to index
    %c0_44 = arith.constant 0 : index
    %144 = vector.load %arg13[%143, %c0_44] : memref<16x128xf32, #tpu.memory_space<vmem>>, vector<2x128xf32>
    %cst_45 = arith.constant dense<0.000000e+00> : vector<2x128xf32>
    %145 = tpu.matmul %138, %7, %cst_45 {dimension_numbers = #tpu.dot_dimension_numbers<[1], [0], [0], [1], [0, 0, 1, 1], [], []>} : vector<2x32xf32>, vector<32x128xf32>, vector<2x128xf32> -> vector<2x128xf32>
    %146 = arith.addf %144, %145 : vector<2x128xf32>
    %147 = vector.extract_strided_slice %146 {offsets = [0, 0], sizes = [2, 32], strides = [1, 1]} : vector<2x128xf32> to vector<2x32xf32>
    %148 = arith.negf %147 : vector<2x32xf32>
    %149 = math.exp %148 : vector<2x32xf32>
    %cst_46 = arith.constant 1.000000e+00 : f32
    %150 = vector.broadcast %cst_46 : f32 to vector<2x32xf32>
    %151 = arith.addf %150, %149 : vector<2x32xf32>
    %152 = arith.divf %150, %151 : vector<2x32xf32>
    %153 = vector.extract_strided_slice %146 {offsets = [0, 32], sizes = [2, 32], strides = [1, 1]} : vector<2x128xf32> to vector<2x32xf32>
    %154 = arith.negf %153 : vector<2x32xf32>
    %155 = math.exp %154 : vector<2x32xf32>
    %cst_47 = arith.constant 1.000000e+00 : f32
    %156 = vector.broadcast %cst_47 : f32 to vector<2x32xf32>
    %157 = arith.addf %156, %155 : vector<2x32xf32>
    %158 = arith.divf %156, %157 : vector<2x32xf32>
    %159 = vector.extract_strided_slice %146 {offsets = [0, 64], sizes = [2, 32], strides = [1, 1]} : vector<2x128xf32> to vector<2x32xf32>
    %160 = math.tanh %159 : vector<2x32xf32>
    %161 = vector.extract_strided_slice %146 {offsets = [0, 96], sizes = [2, 32], strides = [1, 1]} : vector<2x128xf32> to vector<2x32xf32>
    %162 = arith.negf %161 : vector<2x32xf32>
    %163 = math.exp %162 : vector<2x32xf32>
    %cst_48 = arith.constant 1.000000e+00 : f32
    %164 = vector.broadcast %cst_48 : f32 to vector<2x32xf32>
    %165 = arith.addf %164, %163 : vector<2x32xf32>
    %166 = arith.divf %164, %165 : vector<2x32xf32>
    %167 = arith.mulf %158, %136 : vector<2x32xf32>
    %168 = arith.mulf %152, %160 : vector<2x32xf32>
    %169 = arith.addf %167, %168 : vector<2x32xf32>
    %170 = math.tanh %169 : vector<2x32xf32>
    %171 = arith.mulf %166, %170 : vector<2x32xf32>
    %c2_i32_49 = arith.constant 2 : i32
    %172 = arith.muli %c4_i32, %c2_i32_49 : i32
    %173 = arith.index_cast %172 : i32 to index
    %c0_50 = arith.constant 0 : index
    %174 = vector.load %arg12[%173, %c0_50] : memref<16x32xf32, #tpu.memory_space<vmem>>, vector<2x32xf32>
    tpu.vector_store %arg12[%173, %c0_50], %171 {strides = array<i32>} : memref<16x32xf32, #tpu.memory_space<vmem>>, vector<2x32xf32>,
    %c5_i32 = arith.constant 5 : i32
    %c2_i32_51 = arith.constant 2 : i32
    %175 = arith.muli %c5_i32, %c2_i32_51 : i32
    %176 = arith.index_cast %175 : i32 to index
    %c0_52 = arith.constant 0 : index
    %177 = vector.load %arg13[%176, %c0_52] : memref<16x128xf32, #tpu.memory_space<vmem>>, vector<2x128xf32>
    %cst_53 = arith.constant dense<0.000000e+00> : vector<2x128xf32>
    %178 = tpu.matmul %171, %7, %cst_53 {dimension_numbers = #tpu.dot_dimension_numbers<[1], [0], [0], [1], [0, 0, 1, 1], [], []>} : vector<2x32xf32>, vector<32x128xf32>, vector<2x128xf32> -> vector<2x128xf32>
    %179 = arith.addf %177, %178 : vector<2x128xf32>
    %180 = vector.extract_strided_slice %179 {offsets = [0, 0], sizes = [2, 32], strides = [1, 1]} : vector<2x128xf32> to vector<2x32xf32>
    %181 = arith.negf %180 : vector<2x32xf32>
    %182 = math.exp %181 : vector<2x32xf32>
    %cst_54 = arith.constant 1.000000e+00 : f32
    %183 = vector.broadcast %cst_54 : f32 to vector<2x32xf32>
    %184 = arith.addf %183, %182 : vector<2x32xf32>
    %185 = arith.divf %183, %184 : vector<2x32xf32>
    %186 = vector.extract_strided_slice %179 {offsets = [0, 32], sizes = [2, 32], strides = [1, 1]} : vector<2x128xf32> to vector<2x32xf32>
    %187 = arith.negf %186 : vector<2x32xf32>
    %188 = math.exp %187 : vector<2x32xf32>
    %cst_55 = arith.constant 1.000000e+00 : f32
    %189 = vector.broadcast %cst_55 : f32 to vector<2x32xf32>
    %190 = arith.addf %189, %188 : vector<2x32xf32>
    %191 = arith.divf %189, %190 : vector<2x32xf32>
    %192 = vector.extract_strided_slice %179 {offsets = [0, 64], sizes = [2, 32], strides = [1, 1]} : vector<2x128xf32> to vector<2x32xf32>
    %193 = math.tanh %192 : vector<2x32xf32>
    %194 = vector.extract_strided_slice %179 {offsets = [0, 96], sizes = [2, 32], strides = [1, 1]} : vector<2x128xf32> to vector<2x32xf32>
    %195 = arith.negf %194 : vector<2x32xf32>
    %196 = math.exp %195 : vector<2x32xf32>
    %cst_56 = arith.constant 1.000000e+00 : f32
    %197 = vector.broadcast %cst_56 : f32 to vector<2x32xf32>
    %198 = arith.addf %197, %196 : vector<2x32xf32>
    %199 = arith.divf %197, %198 : vector<2x32xf32>
    %200 = arith.mulf %191, %169 : vector<2x32xf32>
    %201 = arith.mulf %185, %193 : vector<2x32xf32>
    %202 = arith.addf %200, %201 : vector<2x32xf32>
    %203 = math.tanh %202 : vector<2x32xf32>
    %204 = arith.mulf %199, %203 : vector<2x32xf32>
    %c2_i32_57 = arith.constant 2 : i32
    %205 = arith.muli %c5_i32, %c2_i32_57 : i32
    %206 = arith.index_cast %205 : i32 to index
    %c0_58 = arith.constant 0 : index
    %207 = vector.load %arg12[%206, %c0_58] : memref<16x32xf32, #tpu.memory_space<vmem>>, vector<2x32xf32>
    tpu.vector_store %arg12[%206, %c0_58], %204 {strides = array<i32>} : memref<16x32xf32, #tpu.memory_space<vmem>>, vector<2x32xf32>,
    %c6_i32 = arith.constant 6 : i32
    %c2_i32_59 = arith.constant 2 : i32
    %208 = arith.muli %c6_i32, %c2_i32_59 : i32
    %209 = arith.index_cast %208 : i32 to index
    %c0_60 = arith.constant 0 : index
    %210 = vector.load %arg13[%209, %c0_60] : memref<16x128xf32, #tpu.memory_space<vmem>>, vector<2x128xf32>
    %cst_61 = arith.constant dense<0.000000e+00> : vector<2x128xf32>
    %211 = tpu.matmul %204, %7, %cst_61 {dimension_numbers = #tpu.dot_dimension_numbers<[1], [0], [0], [1], [0, 0, 1, 1], [], []>} : vector<2x32xf32>, vector<32x128xf32>, vector<2x128xf32> -> vector<2x128xf32>
    %212 = arith.addf %210, %211 : vector<2x128xf32>
    %213 = vector.extract_strided_slice %212 {offsets = [0, 0], sizes = [2, 32], strides = [1, 1]} : vector<2x128xf32> to vector<2x32xf32>
    %214 = arith.negf %213 : vector<2x32xf32>
    %215 = math.exp %214 : vector<2x32xf32>
    %cst_62 = arith.constant 1.000000e+00 : f32
    %216 = vector.broadcast %cst_62 : f32 to vector<2x32xf32>
    %217 = arith.addf %216, %215 : vector<2x32xf32>
    %218 = arith.divf %216, %217 : vector<2x32xf32>
    %219 = vector.extract_strided_slice %212 {offsets = [0, 32], sizes = [2, 32], strides = [1, 1]} : vector<2x128xf32> to vector<2x32xf32>
    %220 = arith.negf %219 : vector<2x32xf32>
    %221 = math.exp %220 : vector<2x32xf32>
    %cst_63 = arith.constant 1.000000e+00 : f32
    %222 = vector.broadcast %cst_63 : f32 to vector<2x32xf32>
    %223 = arith.addf %222, %221 : vector<2x32xf32>
    %224 = arith.divf %222, %223 : vector<2x32xf32>
    %225 = vector.extract_strided_slice %212 {offsets = [0, 64], sizes = [2, 32], strides = [1, 1]} : vector<2x128xf32> to vector<2x32xf32>
    %226 = math.tanh %225 : vector<2x32xf32>
    %227 = vector.extract_strided_slice %212 {offsets = [0, 96], sizes = [2, 32], strides = [1, 1]} : vector<2x128xf32> to vector<2x32xf32>
    %228 = arith.negf %227 : vector<2x32xf32>
    %229 = math.exp %228 : vector<2x32xf32>
    %cst_64 = arith.constant 1.000000e+00 : f32
    %230 = vector.broadcast %cst_64 : f32 to vector<2x32xf32>
    %231 = arith.addf %230, %229 : vector<2x32xf32>
    %232 = arith.divf %230, %231 : vector<2x32xf32>
    %233 = arith.mulf %224, %202 : vector<2x32xf32>
    %234 = arith.mulf %218, %226 : vector<2x32xf32>
    %235 = arith.addf %233, %234 : vector<2x32xf32>
    %236 = math.tanh %235 : vector<2x32xf32>
    %237 = arith.mulf %232, %236 : vector<2x32xf32>
    %c2_i32_65 = arith.constant 2 : i32
    %238 = arith.muli %c6_i32, %c2_i32_65 : i32
    %239 = arith.index_cast %238 : i32 to index
    %c0_66 = arith.constant 0 : index
    %240 = vector.load %arg12[%239, %c0_66] : memref<16x32xf32, #tpu.memory_space<vmem>>, vector<2x32xf32>
    tpu.vector_store %arg12[%239, %c0_66], %237 {strides = array<i32>} : memref<16x32xf32, #tpu.memory_space<vmem>>, vector<2x32xf32>,
    %c7_i32 = arith.constant 7 : i32
    %c2_i32_67 = arith.constant 2 : i32
    %241 = arith.muli %c7_i32, %c2_i32_67 : i32
    %242 = arith.index_cast %241 : i32 to index
    %c0_68 = arith.constant 0 : index
    %243 = vector.load %arg13[%242, %c0_68] : memref<16x128xf32, #tpu.memory_space<vmem>>, vector<2x128xf32>
    %cst_69 = arith.constant dense<0.000000e+00> : vector<2x128xf32>
    %244 = tpu.matmul %237, %7, %cst_69 {dimension_numbers = #tpu.dot_dimension_numbers<[1], [0], [0], [1], [0, 0, 1, 1], [], []>} : vector<2x32xf32>, vector<32x128xf32>, vector<2x128xf32> -> vector<2x128xf32>
    %245 = arith.addf %243, %244 : vector<2x128xf32>
    %246 = vector.extract_strided_slice %245 {offsets = [0, 0], sizes = [2, 32], strides = [1, 1]} : vector<2x128xf32> to vector<2x32xf32>
    %247 = arith.negf %246 : vector<2x32xf32>
    %248 = math.exp %247 : vector<2x32xf32>
    %cst_70 = arith.constant 1.000000e+00 : f32
    %249 = vector.broadcast %cst_70 : f32 to vector<2x32xf32>
    %250 = arith.addf %249, %248 : vector<2x32xf32>
    %251 = arith.divf %249, %250 : vector<2x32xf32>
    %252 = vector.extract_strided_slice %245 {offsets = [0, 32], sizes = [2, 32], strides = [1, 1]} : vector<2x128xf32> to vector<2x32xf32>
    %253 = arith.negf %252 : vector<2x32xf32>
    %254 = math.exp %253 : vector<2x32xf32>
    %cst_71 = arith.constant 1.000000e+00 : f32
    %255 = vector.broadcast %cst_71 : f32 to vector<2x32xf32>
    %256 = arith.addf %255, %254 : vector<2x32xf32>
    %257 = arith.divf %255, %256 : vector<2x32xf32>
    %258 = vector.extract_strided_slice %245 {offsets = [0, 64], sizes = [2, 32], strides = [1, 1]} : vector<2x128xf32> to vector<2x32xf32>
    %259 = math.tanh %258 : vector<2x32xf32>
    %260 = vector.extract_strided_slice %245 {offsets = [0, 96], sizes = [2, 32], strides = [1, 1]} : vector<2x128xf32> to vector<2x32xf32>
    %261 = arith.negf %260 : vector<2x32xf32>
    %262 = math.exp %261 : vector<2x32xf32>
    %cst_72 = arith.constant 1.000000e+00 : f32
    %263 = vector.broadcast %cst_72 : f32 to vector<2x32xf32>
    %264 = arith.addf %263, %262 : vector<2x32xf32>
    %265 = arith.divf %263, %264 : vector<2x32xf32>
    %266 = arith.mulf %257, %235 : vector<2x32xf32>
    %267 = arith.mulf %251, %259 : vector<2x32xf32>
    %268 = arith.addf %266, %267 : vector<2x32xf32>
    %269 = math.tanh %268 : vector<2x32xf32>
    %270 = arith.mulf %265, %269 : vector<2x32xf32>
    %c2_i32_73 = arith.constant 2 : i32
    %271 = arith.muli %c7_i32, %c2_i32_73 : i32
    %272 = arith.index_cast %271 : i32 to index
    %c0_74 = arith.constant 0 : index
    %273 = vector.load %arg12[%272, %c0_74] : memref<16x32xf32, #tpu.memory_space<vmem>>, vector<2x32xf32>
    tpu.vector_store %arg12[%272, %c0_74], %270 {strides = array<i32>} : memref<16x32xf32, #tpu.memory_space<vmem>>, vector<2x32xf32>,
    %c8_i32 = arith.constant 8 : i32
    %c0_75 = arith.constant 0 : index
    %c0_76 = arith.constant 0 : index
    %c0_77 = arith.constant 0 : index
    %274 = vector.load %arg10[%c0_75, %c0_76, %c0_77] : memref<2x2x32xf32, #tpu.memory_space<vmem>>, vector<1x2x32xf32>
    %275 = vector.shape_cast %274 : vector<1x2x32xf32> to vector<2x32xf32>
    %276 = vector.shape_cast %270 : vector<2x32xf32> to vector<1x2x32xf32>
    tpu.vector_store %arg10[%c0_75, %c0_76, %c0_77], %276 {strides = array<i32>} : memref<2x2x32xf32, #tpu.memory_space<vmem>>, vector<1x2x32xf32>,
    %c0_78 = arith.constant 0 : index
    %c0_79 = arith.constant 0 : index
    %c0_80 = arith.constant 0 : index
    %277 = vector.load %arg11[%c0_78, %c0_79, %c0_80] : memref<2x2x32xf32, #tpu.memory_space<vmem>>, vector<1x2x32xf32>
    %278 = vector.shape_cast %277 : vector<1x2x32xf32> to vector<2x32xf32>
    %279 = vector.shape_cast %268 : vector<2x32xf32> to vector<1x2x32xf32>
    tpu.vector_store %arg11[%c0_78, %c0_79, %c0_80], %279 {strides = array<i32>} : memref<2x2x32xf32, #tpu.memory_space<vmem>>, vector<1x2x32xf32>,
    %c0_81 = arith.constant 0 : index
    %c0_82 = arith.constant 0 : index
    %280 = vector.load %arg12[%c0_81, %c0_82] : memref<16x32xf32, #tpu.memory_space<vmem>>, vector<16x32xf32>
    %c0_83 = arith.constant 0 : index
    %c0_84 = arith.constant 0 : index
    %281 = vector.load %arg4[%c0_83, %c0_84] : memref<32x128xf32, #tpu.memory_space<vmem>>, vector<32x128xf32>
    %cst_85 = arith.constant dense<0.000000e+00> : vector<16x128xf32>
    %282 = tpu.matmul %280, %281, %cst_85 {dimension_numbers = #tpu.dot_dimension_numbers<[1], [0], [0], [1], [0, 0, 1, 1], [], []>} : vector<16x32xf32>, vector<32x128xf32>, vector<16x128xf32> -> vector<16x128xf32>
    %c0_86 = arith.constant 0 : index
    %c0_87 = arith.constant 0 : index
    %283 = vector.load %arg6[%c0_86, %c0_87] : memref<1x128xf32, #tpu.memory_space<vmem>>, vector<1x128xf32>
    %284 = vector.broadcast %283 : vector<1x128xf32> to vector<16x128xf32>
    %285 = arith.addf %282, %284 : vector<16x128xf32>
    %c0_88 = arith.constant 0 : index
    %c0_89 = arith.constant 0 : index
    %286 = vector.load %arg13[%c0_88, %c0_89] : memref<16x128xf32, #tpu.memory_space<vmem>>, vector<16x128xf32>
    tpu.vector_store %arg13[%c0_88, %c0_89], %285 {strides = array<i32>} : memref<16x128xf32, #tpu.memory_space<vmem>>, vector<16x128xf32>,
    %c0_90 = arith.constant 0 : index
    %c0_91 = arith.constant 0 : index
    %287 = vector.load %arg5[%c0_90, %c0_91] : memref<32x128xf32, #tpu.memory_space<vmem>>, vector<32x128xf32>
    %cst_92 = arith.constant 0.000000e+00 : f32
    %288 = vector.broadcast %cst_92 : f32 to vector<2x32xf32>
    %cst_93 = arith.constant 0.000000e+00 : f32
    %289 = vector.broadcast %cst_93 : f32 to vector<2x32xf32>
    %c0_i32_94 = arith.constant 0 : i32
    %c2_i32_95 = arith.constant 2 : i32
    %290 = arith.muli %c0_i32_94, %c2_i32_95 : i32
    %291 = arith.index_cast %290 : i32 to index
    %c0_96 = arith.constant 0 : index
    %292 = vector.load %arg13[%291, %c0_96] : memref<16x128xf32, #tpu.memory_space<vmem>>, vector<2x128xf32>
    %cst_97 = arith.constant dense<0.000000e+00> : vector<2x128xf32>
    %293 = tpu.matmul %288, %287, %cst_97 {dimension_numbers = #tpu.dot_dimension_numbers<[1], [0], [0], [1], [0, 0, 1, 1], [], []>} : vector<2x32xf32>, vector<32x128xf32>, vector<2x128xf32> -> vector<2x128xf32>
    %294 = arith.addf %292, %293 : vector<2x128xf32>
    %295 = vector.extract_strided_slice %294 {offsets = [0, 0], sizes = [2, 32], strides = [1, 1]} : vector<2x128xf32> to vector<2x32xf32>
    %296 = arith.negf %295 : vector<2x32xf32>
    %297 = math.exp %296 : vector<2x32xf32>
    %cst_98 = arith.constant 1.000000e+00 : f32
    %298 = vector.broadcast %cst_98 : f32 to vector<2x32xf32>
    %299 = arith.addf %298, %297 : vector<2x32xf32>
    %300 = arith.divf %298, %299 : vector<2x32xf32>
    %301 = vector.extract_strided_slice %294 {offsets = [0, 32], sizes = [2, 32], strides = [1, 1]} : vector<2x128xf32> to vector<2x32xf32>
    %302 = arith.negf %301 : vector<2x32xf32>
    %303 = math.exp %302 : vector<2x32xf32>
    %cst_99 = arith.constant 1.000000e+00 : f32
    %304 = vector.broadcast %cst_99 : f32 to vector<2x32xf32>
    %305 = arith.addf %304, %303 : vector<2x32xf32>
    %306 = arith.divf %304, %305 : vector<2x32xf32>
    %307 = vector.extract_strided_slice %294 {offsets = [0, 64], sizes = [2, 32], strides = [1, 1]} : vector<2x128xf32> to vector<2x32xf32>
    %308 = math.tanh %307 : vector<2x32xf32>
    %309 = vector.extract_strided_slice %294 {offsets = [0, 96], sizes = [2, 32], strides = [1, 1]} : vector<2x128xf32> to vector<2x32xf32>
    %310 = arith.negf %309 : vector<2x32xf32>
    %311 = math.exp %310 : vector<2x32xf32>
    %cst_100 = arith.constant 1.000000e+00 : f32
    %312 = vector.broadcast %cst_100 : f32 to vector<2x32xf32>
    %313 = arith.addf %312, %311 : vector<2x32xf32>
    %314 = arith.divf %312, %313 : vector<2x32xf32>
    %315 = arith.mulf %306, %289 : vector<2x32xf32>
    %316 = arith.mulf %300, %308 : vector<2x32xf32>
    %317 = arith.addf %315, %316 : vector<2x32xf32>
    %318 = math.tanh %317 : vector<2x32xf32>
    %319 = arith.mulf %314, %318 : vector<2x32xf32>
    %c1_i32_101 = arith.constant 1 : i32
    %c2_i32_102 = arith.constant 2 : i32
    %320 = arith.muli %c1_i32_101, %c2_i32_102 : i32
    %321 = arith.index_cast %320 : i32 to index
    %c0_103 = arith.constant 0 : index
    %322 = vector.load %arg13[%321, %c0_103] : memref<16x128xf32, #tpu.memory_space<vmem>>, vector<2x128xf32>
    %cst_104 = arith.constant dense<0.000000e+00> : vector<2x128xf32>
    %323 = tpu.matmul %319, %287, %cst_104 {dimension_numbers = #tpu.dot_dimension_numbers<[1], [0], [0], [1], [0, 0, 1, 1], [], []>} : vector<2x32xf32>, vector<32x128xf32>, vector<2x128xf32> -> vector<2x128xf32>
    %324 = arith.addf %322, %323 : vector<2x128xf32>
    %325 = vector.extract_strided_slice %324 {offsets = [0, 0], sizes = [2, 32], strides = [1, 1]} : vector<2x128xf32> to vector<2x32xf32>
    %326 = arith.negf %325 : vector<2x32xf32>
    %327 = math.exp %326 : vector<2x32xf32>
    %cst_105 = arith.constant 1.000000e+00 : f32
    %328 = vector.broadcast %cst_105 : f32 to vector<2x32xf32>
    %329 = arith.addf %328, %327 : vector<2x32xf32>
    %330 = arith.divf %328, %329 : vector<2x32xf32>
    %331 = vector.extract_strided_slice %324 {offsets = [0, 32], sizes = [2, 32], strides = [1, 1]} : vector<2x128xf32> to vector<2x32xf32>
    %332 = arith.negf %331 : vector<2x32xf32>
    %333 = math.exp %332 : vector<2x32xf32>
    %cst_106 = arith.constant 1.000000e+00 : f32
    %334 = vector.broadcast %cst_106 : f32 to vector<2x32xf32>
    %335 = arith.addf %334, %333 : vector<2x32xf32>
    %336 = arith.divf %334, %335 : vector<2x32xf32>
    %337 = vector.extract_strided_slice %324 {offsets = [0, 64], sizes = [2, 32], strides = [1, 1]} : vector<2x128xf32> to vector<2x32xf32>
    %338 = math.tanh %337 : vector<2x32xf32>
    %339 = vector.extract_strided_slice %324 {offsets = [0, 96], sizes = [2, 32], strides = [1, 1]} : vector<2x128xf32> to vector<2x32xf32>
    %340 = arith.negf %339 : vector<2x32xf32>
    %341 = math.exp %340 : vector<2x32xf32>
    %cst_107 = arith.constant 1.000000e+00 : f32
    %342 = vector.broadcast %cst_107 : f32 to vector<2x32xf32>
    %343 = arith.addf %342, %341 : vector<2x32xf32>
    %344 = arith.divf %342, %343 : vector<2x32xf32>
    %345 = arith.mulf %336, %317 : vector<2x32xf32>
    %346 = arith.mulf %330, %338 : vector<2x32xf32>
    %347 = arith.addf %345, %346 : vector<2x32xf32>
    %348 = math.tanh %347 : vector<2x32xf32>
    %349 = arith.mulf %344, %348 : vector<2x32xf32>
    %c2_i32_108 = arith.constant 2 : i32
    %c2_i32_109 = arith.constant 2 : i32
    %350 = arith.muli %c2_i32_108, %c2_i32_109 : i32
    %351 = arith.index_cast %350 : i32 to index
    %c0_110 = arith.constant 0 : index
    %352 = vector.load %arg13[%351, %c0_110] : memref<16x128xf32, #tpu.memory_space<vmem>>, vector<2x128xf32>
    %cst_111 = arith.constant dense<0.000000e+00> : vector<2x128xf32>
    %353 = tpu.matmul %349, %287, %cst_111 {dimension_numbers = #tpu.dot_dimension_numbers<[1], [0], [0], [1], [0, 0, 1, 1], [], []>} : vector<2x32xf32>, vector<32x128xf32>, vector<2x128xf32> -> vector<2x128xf32>
    %354 = arith.addf %352, %353 : vector<2x128xf32>
    %355 = vector.extract_strided_slice %354 {offsets = [0, 0], sizes = [2, 32], strides = [1, 1]} : vector<2x128xf32> to vector<2x32xf32>
    %356 = arith.negf %355 : vector<2x32xf32>
    %357 = math.exp %356 : vector<2x32xf32>
    %cst_112 = arith.constant 1.000000e+00 : f32
    %358 = vector.broadcast %cst_112 : f32 to vector<2x32xf32>
    %359 = arith.addf %358, %357 : vector<2x32xf32>
    %360 = arith.divf %358, %359 : vector<2x32xf32>
    %361 = vector.extract_strided_slice %354 {offsets = [0, 32], sizes = [2, 32], strides = [1, 1]} : vector<2x128xf32> to vector<2x32xf32>
    %362 = arith.negf %361 : vector<2x32xf32>
    %363 = math.exp %362 : vector<2x32xf32>
    %cst_113 = arith.constant 1.000000e+00 : f32
    %364 = vector.broadcast %cst_113 : f32 to vector<2x32xf32>
    %365 = arith.addf %364, %363 : vector<2x32xf32>
    %366 = arith.divf %364, %365 : vector<2x32xf32>
    %367 = vector.extract_strided_slice %354 {offsets = [0, 64], sizes = [2, 32], strides = [1, 1]} : vector<2x128xf32> to vector<2x32xf32>
    %368 = math.tanh %367 : vector<2x32xf32>
    %369 = vector.extract_strided_slice %354 {offsets = [0, 96], sizes = [2, 32], strides = [1, 1]} : vector<2x128xf32> to vector<2x32xf32>
    %370 = arith.negf %369 : vector<2x32xf32>
    %371 = math.exp %370 : vector<2x32xf32>
    %cst_114 = arith.constant 1.000000e+00 : f32
    %372 = vector.broadcast %cst_114 : f32 to vector<2x32xf32>
    %373 = arith.addf %372, %371 : vector<2x32xf32>
    %374 = arith.divf %372, %373 : vector<2x32xf32>
    %375 = arith.mulf %366, %347 : vector<2x32xf32>
    %376 = arith.mulf %360, %368 : vector<2x32xf32>
    %377 = arith.addf %375, %376 : vector<2x32xf32>
    %378 = math.tanh %377 : vector<2x32xf32>
    %379 = arith.mulf %374, %378 : vector<2x32xf32>
    %c3_i32_115 = arith.constant 3 : i32
    %c2_i32_116 = arith.constant 2 : i32
    %380 = arith.muli %c3_i32_115, %c2_i32_116 : i32
    %381 = arith.index_cast %380 : i32 to index
    %c0_117 = arith.constant 0 : index
    %382 = vector.load %arg13[%381, %c0_117] : memref<16x128xf32, #tpu.memory_space<vmem>>, vector<2x128xf32>
    %cst_118 = arith.constant dense<0.000000e+00> : vector<2x128xf32>
    %383 = tpu.matmul %379, %287, %cst_118 {dimension_numbers = #tpu.dot_dimension_numbers<[1], [0], [0], [1], [0, 0, 1, 1], [], []>} : vector<2x32xf32>, vector<32x128xf32>, vector<2x128xf32> -> vector<2x128xf32>
    %384 = arith.addf %382, %383 : vector<2x128xf32>
    %385 = vector.extract_strided_slice %384 {offsets = [0, 0], sizes = [2, 32], strides = [1, 1]} : vector<2x128xf32> to vector<2x32xf32>
    %386 = arith.negf %385 : vector<2x32xf32>
    %387 = math.exp %386 : vector<2x32xf32>
    %cst_119 = arith.constant 1.000000e+00 : f32
    %388 = vector.broadcast %cst_119 : f32 to vector<2x32xf32>
    %389 = arith.addf %388, %387 : vector<2x32xf32>
    %390 = arith.divf %388, %389 : vector<2x32xf32>
    %391 = vector.extract_strided_slice %384 {offsets = [0, 32], sizes = [2, 32], strides = [1, 1]} : vector<2x128xf32> to vector<2x32xf32>
    %392 = arith.negf %391 : vector<2x32xf32>
    %393 = math.exp %392 : vector<2x32xf32>
    %cst_120 = arith.constant 1.000000e+00 : f32
    %394 = vector.broadcast %cst_120 : f32 to vector<2x32xf32>
    %395 = arith.addf %394, %393 : vector<2x32xf32>
    %396 = arith.divf %394, %395 : vector<2x32xf32>
    %397 = vector.extract_strided_slice %384 {offsets = [0, 64], sizes = [2, 32], strides = [1, 1]} : vector<2x128xf32> to vector<2x32xf32>
    %398 = math.tanh %397 : vector<2x32xf32>
    %399 = vector.extract_strided_slice %384 {offsets = [0, 96], sizes = [2, 32], strides = [1, 1]} : vector<2x128xf32> to vector<2x32xf32>
    %400 = arith.negf %399 : vector<2x32xf32>
    %401 = math.exp %400 : vector<2x32xf32>
    %cst_121 = arith.constant 1.000000e+00 : f32
    %402 = vector.broadcast %cst_121 : f32 to vector<2x32xf32>
    %403 = arith.addf %402, %401 : vector<2x32xf32>
    %404 = arith.divf %402, %403 : vector<2x32xf32>
    %405 = arith.mulf %396, %377 : vector<2x32xf32>
    %406 = arith.mulf %390, %398 : vector<2x32xf32>
    %407 = arith.addf %405, %406 : vector<2x32xf32>
    %408 = math.tanh %407 : vector<2x32xf32>
    %409 = arith.mulf %404, %408 : vector<2x32xf32>
    %c4_i32_122 = arith.constant 4 : i32
    %c2_i32_123 = arith.constant 2 : i32
    %410 = arith.muli %c4_i32_122, %c2_i32_123 : i32
    %411 = arith.index_cast %410 : i32 to index
    %c0_124 = arith.constant 0 : index
    %412 = vector.load %arg13[%411, %c0_124] : memref<16x128xf32, #tpu.memory_space<vmem>>, vector<2x128xf32>
    %cst_125 = arith.constant dense<0.000000e+00> : vector<2x128xf32>
    %413 = tpu.matmul %409, %287, %cst_125 {dimension_numbers = #tpu.dot_dimension_numbers<[1], [0], [0], [1], [0, 0, 1, 1], [], []>} : vector<2x32xf32>, vector<32x128xf32>, vector<2x128xf32> -> vector<2x128xf32>
    %414 = arith.addf %412, %413 : vector<2x128xf32>
    %415 = vector.extract_strided_slice %414 {offsets = [0, 0], sizes = [2, 32], strides = [1, 1]} : vector<2x128xf32> to vector<2x32xf32>
    %416 = arith.negf %415 : vector<2x32xf32>
    %417 = math.exp %416 : vector<2x32xf32>
    %cst_126 = arith.constant 1.000000e+00 : f32
    %418 = vector.broadcast %cst_126 : f32 to vector<2x32xf32>
    %419 = arith.addf %418, %417 : vector<2x32xf32>
    %420 = arith.divf %418, %419 : vector<2x32xf32>
    %421 = vector.extract_strided_slice %414 {offsets = [0, 32], sizes = [2, 32], strides = [1, 1]} : vector<2x128xf32> to vector<2x32xf32>
    %422 = arith.negf %421 : vector<2x32xf32>
    %423 = math.exp %422 : vector<2x32xf32>
    %cst_127 = arith.constant 1.000000e+00 : f32
    %424 = vector.broadcast %cst_127 : f32 to vector<2x32xf32>
    %425 = arith.addf %424, %423 : vector<2x32xf32>
    %426 = arith.divf %424, %425 : vector<2x32xf32>
    %427 = vector.extract_strided_slice %414 {offsets = [0, 64], sizes = [2, 32], strides = [1, 1]} : vector<2x128xf32> to vector<2x32xf32>
    %428 = math.tanh %427 : vector<2x32xf32>
    %429 = vector.extract_strided_slice %414 {offsets = [0, 96], sizes = [2, 32], strides = [1, 1]} : vector<2x128xf32> to vector<2x32xf32>
    %430 = arith.negf %429 : vector<2x32xf32>
    %431 = math.exp %430 : vector<2x32xf32>
    %cst_128 = arith.constant 1.000000e+00 : f32
    %432 = vector.broadcast %cst_128 : f32 to vector<2x32xf32>
    %433 = arith.addf %432, %431 : vector<2x32xf32>
    %434 = arith.divf %432, %433 : vector<2x32xf32>
    %435 = arith.mulf %426, %407 : vector<2x32xf32>
    %436 = arith.mulf %420, %428 : vector<2x32xf32>
    %437 = arith.addf %435, %436 : vector<2x32xf32>
    %438 = math.tanh %437 : vector<2x32xf32>
    %439 = arith.mulf %434, %438 : vector<2x32xf32>
    %c5_i32_129 = arith.constant 5 : i32
    %c2_i32_130 = arith.constant 2 : i32
    %440 = arith.muli %c5_i32_129, %c2_i32_130 : i32
    %441 = arith.index_cast %440 : i32 to index
    %c0_131 = arith.constant 0 : index
    %442 = vector.load %arg13[%441, %c0_131] : memref<16x128xf32, #tpu.memory_space<vmem>>, vector<2x128xf32>
    %cst_132 = arith.constant dense<0.000000e+00> : vector<2x128xf32>
    %443 = tpu.matmul %439, %287, %cst_132 {dimension_numbers = #tpu.dot_dimension_numbers<[1], [0], [0], [1], [0, 0, 1, 1], [], []>} : vector<2x32xf32>, vector<32x128xf32>, vector<2x128xf32> -> vector<2x128xf32>
    %444 = arith.addf %442, %443 : vector<2x128xf32>
    %445 = vector.extract_strided_slice %444 {offsets = [0, 0], sizes = [2, 32], strides = [1, 1]} : vector<2x128xf32> to vector<2x32xf32>
    %446 = arith.negf %445 : vector<2x32xf32>
    %447 = math.exp %446 : vector<2x32xf32>
    %cst_133 = arith.constant 1.000000e+00 : f32
    %448 = vector.broadcast %cst_133 : f32 to vector<2x32xf32>
    %449 = arith.addf %448, %447 : vector<2x32xf32>
    %450 = arith.divf %448, %449 : vector<2x32xf32>
    %451 = vector.extract_strided_slice %444 {offsets = [0, 32], sizes = [2, 32], strides = [1, 1]} : vector<2x128xf32> to vector<2x32xf32>
    %452 = arith.negf %451 : vector<2x32xf32>
    %453 = math.exp %452 : vector<2x32xf32>
    %cst_134 = arith.constant 1.000000e+00 : f32
    %454 = vector.broadcast %cst_134 : f32 to vector<2x32xf32>
    %455 = arith.addf %454, %453 : vector<2x32xf32>
    %456 = arith.divf %454, %455 : vector<2x32xf32>
    %457 = vector.extract_strided_slice %444 {offsets = [0, 64], sizes = [2, 32], strides = [1, 1]} : vector<2x128xf32> to vector<2x32xf32>
    %458 = math.tanh %457 : vector<2x32xf32>
    %459 = vector.extract_strided_slice %444 {offsets = [0, 96], sizes = [2, 32], strides = [1, 1]} : vector<2x128xf32> to vector<2x32xf32>
    %460 = arith.negf %459 : vector<2x32xf32>
    %461 = math.exp %460 : vector<2x32xf32>
    %cst_135 = arith.constant 1.000000e+00 : f32
    %462 = vector.broadcast %cst_135 : f32 to vector<2x32xf32>
    %463 = arith.addf %462, %461 : vector<2x32xf32>
    %464 = arith.divf %462, %463 : vector<2x32xf32>
    %465 = arith.mulf %456, %437 : vector<2x32xf32>
    %466 = arith.mulf %450, %458 : vector<2x32xf32>
    %467 = arith.addf %465, %466 : vector<2x32xf32>
    %468 = math.tanh %467 : vector<2x32xf32>
    %469 = arith.mulf %464, %468 : vector<2x32xf32>
    %c6_i32_136 = arith.constant 6 : i32
    %c2_i32_137 = arith.constant 2 : i32
    %470 = arith.muli %c6_i32_136, %c2_i32_137 : i32
    %471 = arith.index_cast %470 : i32 to index
    %c0_138 = arith.constant 0 : index
    %472 = vector.load %arg13[%471, %c0_138] : memref<16x128xf32, #tpu.memory_space<vmem>>, vector<2x128xf32>
    %cst_139 = arith.constant dense<0.000000e+00> : vector<2x128xf32>
    %473 = tpu.matmul %469, %287, %cst_139 {dimension_numbers = #tpu.dot_dimension_numbers<[1], [0], [0], [1], [0, 0, 1, 1], [], []>} : vector<2x32xf32>, vector<32x128xf32>, vector<2x128xf32> -> vector<2x128xf32>
    %474 = arith.addf %472, %473 : vector<2x128xf32>
    %475 = vector.extract_strided_slice %474 {offsets = [0, 0], sizes = [2, 32], strides = [1, 1]} : vector<2x128xf32> to vector<2x32xf32>
    %476 = arith.negf %475 : vector<2x32xf32>
    %477 = math.exp %476 : vector<2x32xf32>
    %cst_140 = arith.constant 1.000000e+00 : f32
    %478 = vector.broadcast %cst_140 : f32 to vector<2x32xf32>
    %479 = arith.addf %478, %477 : vector<2x32xf32>
    %480 = arith.divf %478, %479 : vector<2x32xf32>
    %481 = vector.extract_strided_slice %474 {offsets = [0, 32], sizes = [2, 32], strides = [1, 1]} : vector<2x128xf32> to vector<2x32xf32>
    %482 = arith.negf %481 : vector<2x32xf32>
    %483 = math.exp %482 : vector<2x32xf32>
    %cst_141 = arith.constant 1.000000e+00 : f32
    %484 = vector.broadcast %cst_141 : f32 to vector<2x32xf32>
    %485 = arith.addf %484, %483 : vector<2x32xf32>
    %486 = arith.divf %484, %485 : vector<2x32xf32>
    %487 = vector.extract_strided_slice %474 {offsets = [0, 64], sizes = [2, 32], strides = [1, 1]} : vector<2x128xf32> to vector<2x32xf32>
    %488 = math.tanh %487 : vector<2x32xf32>
    %489 = vector.extract_strided_slice %474 {offsets = [0, 96], sizes = [2, 32], strides = [1, 1]} : vector<2x128xf32> to vector<2x32xf32>
    %490 = arith.negf %489 : vector<2x32xf32>
    %491 = math.exp %490 : vector<2x32xf32>
    %cst_142 = arith.constant 1.000000e+00 : f32
    %492 = vector.broadcast %cst_142 : f32 to vector<2x32xf32>
    %493 = arith.addf %492, %491 : vector<2x32xf32>
    %494 = arith.divf %492, %493 : vector<2x32xf32>
    %495 = arith.mulf %486, %467 : vector<2x32xf32>
    %496 = arith.mulf %480, %488 : vector<2x32xf32>
    %497 = arith.addf %495, %496 : vector<2x32xf32>
    %498 = math.tanh %497 : vector<2x32xf32>
    %499 = arith.mulf %494, %498 : vector<2x32xf32>
    %c7_i32_143 = arith.constant 7 : i32
    %c2_i32_144 = arith.constant 2 : i32
    %500 = arith.muli %c7_i32_143, %c2_i32_144 : i32
    %501 = arith.index_cast %500 : i32 to index
    %c0_145 = arith.constant 0 : index
    %502 = vector.load %arg13[%501, %c0_145] : memref<16x128xf32, #tpu.memory_space<vmem>>, vector<2x128xf32>
    %cst_146 = arith.constant dense<0.000000e+00> : vector<2x128xf32>
    %503 = tpu.matmul %499, %287, %cst_146 {dimension_numbers = #tpu.dot_dimension_numbers<[1], [0], [0], [1], [0, 0, 1, 1], [], []>} : vector<2x32xf32>, vector<32x128xf32>, vector<2x128xf32> -> vector<2x128xf32>
    %504 = arith.addf %502, %503 : vector<2x128xf32>
    %505 = vector.extract_strided_slice %504 {offsets = [0, 0], sizes = [2, 32], strides = [1, 1]} : vector<2x128xf32> to vector<2x32xf32>
    %506 = arith.negf %505 : vector<2x32xf32>
    %507 = math.exp %506 : vector<2x32xf32>
    %cst_147 = arith.constant 1.000000e+00 : f32
    %508 = vector.broadcast %cst_147 : f32 to vector<2x32xf32>
    %509 = arith.addf %508, %507 : vector<2x32xf32>
    %510 = arith.divf %508, %509 : vector<2x32xf32>
    %511 = vector.extract_strided_slice %504 {offsets = [0, 32], sizes = [2, 32], strides = [1, 1]} : vector<2x128xf32> to vector<2x32xf32>
    %512 = arith.negf %511 : vector<2x32xf32>
    %513 = math.exp %512 : vector<2x32xf32>
    %cst_148 = arith.constant 1.000000e+00 : f32
    %514 = vector.broadcast %cst_148 : f32 to vector<2x32xf32>
    %515 = arith.addf %514, %513 : vector<2x32xf32>
    %516 = arith.divf %514, %515 : vector<2x32xf32>
    %517 = vector.extract_strided_slice %504 {offsets = [0, 64], sizes = [2, 32], strides = [1, 1]} : vector<2x128xf32> to vector<2x32xf32>
    %518 = math.tanh %517 : vector<2x32xf32>
    %519 = vector.extract_strided_slice %504 {offsets = [0, 96], sizes = [2, 32], strides = [1, 1]} : vector<2x128xf32> to vector<2x32xf32>
    %520 = arith.negf %519 : vector<2x32xf32>
    %521 = math.exp %520 : vector<2x32xf32>
    %cst_149 = arith.constant 1.000000e+00 : f32
    %522 = vector.broadcast %cst_149 : f32 to vector<2x32xf32>
    %523 = arith.addf %522, %521 : vector<2x32xf32>
    %524 = arith.divf %522, %523 : vector<2x32xf32>
    %525 = arith.mulf %516, %497 : vector<2x32xf32>
    %526 = arith.mulf %510, %518 : vector<2x32xf32>
    %527 = arith.addf %525, %526 : vector<2x32xf32>
    %528 = math.tanh %527 : vector<2x32xf32>
    %529 = arith.mulf %524, %528 : vector<2x32xf32>
    %c8_i32_150 = arith.constant 8 : i32
    %c1 = arith.constant 1 : index
    %c0_151 = arith.constant 0 : index
    %c0_152 = arith.constant 0 : index
    %530 = vector.load %arg10[%c1, %c0_151, %c0_152] : memref<2x2x32xf32, #tpu.memory_space<vmem>>, vector<1x2x32xf32>
    %531 = vector.shape_cast %530 : vector<1x2x32xf32> to vector<2x32xf32>
    %532 = vector.shape_cast %529 : vector<2x32xf32> to vector<1x2x32xf32>
    tpu.vector_store %arg10[%c1, %c0_151, %c0_152], %532 {strides = array<i32>} : memref<2x2x32xf32, #tpu.memory_space<vmem>>, vector<1x2x32xf32>,
    %c1_153 = arith.constant 1 : index
    %c0_154 = arith.constant 0 : index
    %c0_155 = arith.constant 0 : index
    %533 = vector.load %arg11[%c1_153, %c0_154, %c0_155] : memref<2x2x32xf32, #tpu.memory_space<vmem>>, vector<1x2x32xf32>
    %534 = vector.shape_cast %533 : vector<1x2x32xf32> to vector<2x32xf32>
    %535 = vector.shape_cast %527 : vector<2x32xf32> to vector<1x2x32xf32>
    tpu.vector_store %arg11[%c1_153, %c0_154, %c0_155], %535 {strides = array<i32>} : memref<2x2x32xf32, #tpu.memory_space<vmem>>, vector<1x2x32xf32>,
    %c0_156 = arith.constant 0 : index
    %c0_157 = arith.constant 0 : index
    %536 = vector.load %arg7[%c0_156, %c0_157] : memref<32x1xf32, #tpu.memory_space<vmem>>, vector<32x1xf32>
    %cst_158 = arith.constant dense<0.000000e+00> : vector<2x1xf32>
    %537 = tpu.matmul %529, %536, %cst_158 {dimension_numbers = #tpu.dot_dimension_numbers<[1], [0], [0], [1], [0, 0, 1, 1], [], []>} : vector<2x32xf32>, vector<32x1xf32>, vector<2x1xf32> -> vector<2x1xf32>
    %c0_159 = arith.constant 0 : index
    %c0_160 = arith.constant 0 : index
    %538 = vector.load %arg8[%c0_159, %c0_160] : memref<1x1xf32, #tpu.memory_space<vmem>>, vector<1x1xf32>
    %539 = vector.broadcast %538 : vector<1x1xf32> to vector<2x1xf32>
    %540 = arith.addf %537, %539 : vector<2x1xf32>
    %c0_161 = arith.constant 0 : index
    %c0_162 = arith.constant 0 : index
    %541 = vector.load %arg9[%c0_161, %c0_162] : memref<2x1xf32, #tpu.memory_space<vmem>>, vector<2x1xf32>
    tpu.vector_store %arg9[%c0_161, %c0_162], %540 {strides = array<i32>} : memref<2x1xf32, #tpu.memory_space<vmem>>, vector<2x1xf32>,
    return
  }
}

</mosaic_0001>

<bundles_post_ra>
// kernel: lstm_model_forward.1
= control target key start
LH: loop header
LB: loop body
LE: loop exit
PB: predicated region body
PF: predicated region fallthrough
CT: control target
= control target key end

     0   :  { %s3059_s0 = inlined_call_operand.vmem [shape: f32[16,4], index: 0, kind: input, shape index: {}]   ;;  %s3060_s1 = inlined_call_operand.vmem [shape: f32[4,128], index: 1, kind: input, shape index: {}]   ;;  %s3061_s2 = inlined_call_operand.vmem [shape: f32[32,128], index: 2, kind: input, shape index: {}]   ;;  %s3062_s3 = inlined_call_operand.vmem [shape: f32[1,128], index: 3, kind: input, shape index: {}]   ;;  %s3063_s4 = inlined_call_operand.vmem [shape: f32[32,128], index: 4, kind: input, shape index: {}]   ;;  %s3064_s5 = inlined_call_operand.hbm [shape: f32[32,128], index: 5, kind: input, shape index: {}]   ;;  %s3065_s6 = inlined_call_operand.vmem [shape: f32[1,128], index: 6, kind: input, shape index: {}]   ;;  %s3066_s7 = inlined_call_operand.vmem [shape: f32[32,1], index: 7, kind: input, shape index: {}]   ;;  %s3067_s8 = inlined_call_operand.<no memory space> [shape: f32[1,1], index: 8, kind: input, shape index: {}]   ;;  %s3068_s9 = inlined_call_operand.vmem [shape: f32[2,1], index: 9, kind: output, shape index: {0}]   ;;  %s3069_s10 = inlined_call_operand.hbm [shape: f32[2,2,32], index: 10, kind: output, shape index: {1}]   ;;  %s3070_s11 = inlined_call_operand.hbm [shape: f32[2,2,32], index: 11, kind: output, shape index: {2}]  }
   0x1   :  { %v17_v0 = vstv %s3067_s8 }
   0x2   :  { %18 = vst [vmem:[#allocation4] sm:$0x1] %v17_v0 }
   0x3   :  { %19 = vsyncpa [#allocation6], 0 }
   0x4   :  { %20 = vsyncpa [#allocation7], 0 }
   0x5   :  { %21 = vsyncpa [#allocation10], 0  ;;  %s2683_s19 = smov [#allocation5]   ;;  %s2611_s23 = scalar_lea.hbm %s3064_s5, 512 }
   0x6   :  { %s37_s20 = sshll.u32 %s2683_s19, 4  ;;  %p2612_p0 = scmp.ne.s32.totalorder %s3064_s5, %s2611_s23  ;;  %s38_s20 = int_to_ptr.vmem [resolvable:$true] %s37_s20 }
   0x7   :  { %p2615_p1 = scmp.lt.u32.totalorder %s2611_s23, %s3064_s5 }
   0x9   :  { %p2617_p2 = pnand %p2615_p1, %p2612_p0 }
   0xb   :  { %2620 = shalt.err (!%p2617_p2)
}
   0xc   :  { %s2621_s8 = scalar_lea.vmem %s38_s20, 512  ;;  %p2626_p4 = scmp.lt.s32.totalorder %s38_s20, %s38_s20 }
   0xd   :  { %p2622_p3 = scmp.ne.s32.totalorder %s38_s20, %s2621_s8  ;;  %p2627_p5 = scmp.lt.s32.totalorder %s2621_s8, %s2621_s8 }
   0xf   :  { %p2628_p6 = por %p2627_p5, %p2626_p4 }
  0x11   :  { %p2629_p7 = pnand %p2628_p6, %p2622_p3 }
  0x13   :  { %2632 = shalt.err (!%p2629_p7)
}
  0x14   :  { %s2684_s28 = smov 128   ;;  %s2685_s29 = smov 8  }
  0x15   :  { %43 = dma.hbm_to_vmem [thread:$0]  %s3064_s5, 512, %s38_s20, [#allocation6], %s2684_s28, %s2684_s28, %s2685_s29  }
  0x16   :  { %2677 = dma.done.wait [#allocation6], 512  }
  0x17   :  { %2678 = vsyncadd [#allocation6], 4294966784  ;;  %v2686_v1 = vmov 0.0|0.0   ;;  %vm2687_vm0 = vmmov 0   ;;  %v2688_v2 = vmov 0.0   ;;  %vm70_vm1 = vcmask 1043456  }
  0x18   :  { %2361 = vmatprep.subr.bf16.mxu1 %v2686_v1  ;;  %2171 = vmatprep.mubr.msk.f32.mxu1 %vm2687_vm0, %v2688_v2  ;;  %vm63_vm2 = vcmask 31744   ;;  %v55_v3 = vld [vmem:[%s3060_s1] sm:$0xf]  ;;  %v54_v5 = vld [vmem:[%s3059_s0 + $0x8] sm:$0xff]  ;;  %v153_v8 = vld [vmem:[%s3061_s2 + $0x10] sm:$0xff]  ;;  %s2689_s25 = smov 64  }
  0x19   :  { %v53_v4 = vld [vmem:[%s3059_s0] sm:$0xff]  ;;  %2158 = vmatprep.subr.msk.mxu0 %vm70_vm1, %v55_v3  ;;  %v152_v7 = vld [vmem:[%s3061_s2 + $0x8] sm:$0xff]  ;;  %v154_v10 = vld [vmem:[%s3061_s2 + $0x18] sm:$0xff]  ;;  %vm259_vm3 = vcmask 254976   ;;  %vm156_vm4 = vcmask 261120   ;;  %s2691_s21 = smov 96  }
  0x1a   :  { %2160 = vmatprep.mubr.msk.f32.mxu0 %vm63_vm2, %v53_v4  ;;  %v151_v6 = vld [vmem:[%s3061_s2] sm:$0xff]  ;;  %2159 = vmatpush3.msk.msra.mxu0 %vm70_vm1, %v55_v3  ;;  %v2798_v11 = vpack.c.bf16 %v154_v10, %v153_v8  ;;  %s2693_s1 = smov [#allocation9]  }
  0x1b   :  { %v2791_v9 = vpack.c.bf16 %v152_v7, %v151_v6  ;;  %2161 = vmatmul.mubr.msk.f32.vlgmr.msra.gmra.mrb[0].mxu0 %vm63_vm2, %v54_v5  ;;  %2367 = vmatprep.subr.bf16.mxu0 %v2686_v1  ;;  %v2025_v12 = vld [vmem:[%s3062_s3] ss:$0 sm:$0xff]  ;;  %s2690_s3 = smov 32   ;;  %s2007_s23 = sshll.u32 %s2693_s1, 4  ;;  %s2008_s23 = int_to_ptr.vmem [resolvable:$true] %s2007_s23 }
  0x1c   :  { %2182 = vmatprep.mubr.msk.f32.mxu0 %vm2687_vm0, %v2688_v2 }
  0x1d   :  { %2363 = vmatpush3.bf16.msra.mxu1 %v2791_v9  ;;  %2369 = vmatpush3.bf16.msra.mxu0 %v2791_v9 }
  0x1e   :  { %2364 = vmatprep.subr.bf16.mxu1 %v2686_v1  ;;  %2370 = vmatprep.subr.bf16.mxu0 %v2686_v1 }
  0x21   :  { %2366 = vmatpush3.bf16.msra.mxu1 %v2798_v11  ;;  %2372 = vmatpush3.bf16.msra.mxu0 %v2798_v11 }
  0x22   :  { %2373 = vmatprep.subr.bf16.mxu1 %v2686_v1  ;;  %2379 = vmatprep.subr.bf16.mxu0 %v2686_v1 }
  0x24   :  { %2172 = vmatmul.mubr.f32.vlgmr.msra.gmra.mrb[0].mxu1 %v2688_v2 }
  0x25   :  { %2375 = vmatpush3.bf16.msra.mxu1 %v2791_v9  ;;  %2193 = vmatprep.mubr.msk.f32.mxu1 %vm2687_vm0, %v2688_v2 }
  0x26   :  { %2376 = vmatprep.subr.bf16.mxu1 %v2686_v1 }
  0x29   :  { %2378 = vmatpush3.bf16.msra.mxu1 %v2798_v11 }
  0x2a   :  { %2385 = vmatprep.subr.bf16.mxu1 %v2686_v1 }
  0xee   :  { %v2162_v13 = vpop.f32.mrb[0].mxu0 }
  0xef   :  { %v146_v14 = vadd.f32 %v2162_v13, %v2025_v12  ;;  %v140_v15 = vpop.f32.mrb[1].mxu0 }
  0xf0   :  { %v141_v16 = vadd.f32 %v2025_v12, %v140_v15 }
  0xf1   :  { %150 = vst [vmem:[#allocation3 + $0x8] sm:$0xff] %v146_v14 }
  0xf2   :  { %149 = vst [vmem:[#allocation3] sm:$0xff] %v141_v16 }
  0xf7   :  { %v226_v17 = vpop.f32.mrb[0].mxu1 }
  0xf8   :  { %v2173_v18 = vpop.f32.mrb[1].mxu1 }
  0xf9   :  { %v155_v19 = vld [vmem:[#allocation3] sm:$0x3]  ;;  %v261_v35 = vld [vmem:[#allocation3 + $0x2] sm:$0x3]  ;;  %v364_v53 = vld [vmem:[#allocation3 + $0x4] sm:$0x3] }
  0xfa   :  { %v230_v20 = vadd.f32 %v226_v17, %v155_v19  ;;  %v467_v10 = vld [vmem:[#allocation3 + $0x6] sm:$0x3] }
  0xfc   :  { %2483 = vtanh.f32 %v230_v20  ;;  %v2029_v22 = vmul.f32 -1.442695, %v230_v20 }
  0xfe   :  { %2485 = vpow2.f32 %v2029_v22 }
 0x106   :  { %v2484_v21 = vpop.eup %2483 }
 0x107   :  { %240 = vrot.lane.b32.xlu0 %v2484_v21, %s2689_s25 }
 0x108   :  { %v2486_v23 = vpop.eup %2485 }
 0x109   :  { %v234_v24 = vadd.f32 1.0, %v2486_v23 }
 0x10b   :  { %2487 = vrcp.f32 %v234_v24 }
 0x115   :  { %v2488_v25 = vpop.eup %2487 }
 0x116   :  { %v238_v28 = vmul.f32 0.0, %v2488_v25 }
 0x179   :  { %v241_v26 = vpop.permute.xlu0 %240 }
 0x17a   :  { %v243_v27 = vmul.f32 %v2488_v25, %v241_v26 }
 0x17c   :  { %245 = vrot.lane.b32.xlu0 %v243_v27, %s2690_s3 }
 0x1ee   :  { %v246_v29 = vpop.permute.xlu0 %245 }
 0x1ef   :  { %v248_v30 = vadd.f32 %v246_v29, %v238_v28  ;;  %v570_v29 = vld [vmem:[#allocation3 + $0x8] sm:$0x3] }
 0x1f1   :  { %2489 = vtanh.f32 %v248_v30 }
 0x1fb   :  { %v2490_v31 = vpop.eup %2489 }
 0x1fc   :  { %251 = vrot.lane.b32.xlu1 %v2490_v31, %s2689_s25 }
 0x26e   :  { %v252_v32 = vpop.permute.xlu1 %251 }
 0x26f   :  { %v254_v33 = vmul.f32 %v2488_v25, %v252_v32 }
 0x271   :  { %256 = vrot.lane.b32.xlu1 %v254_v33, %s2690_s3 }
 0x2e3   :  { %v257_v34 = vpop.permute.xlu1 %256 }
 0x2e4   :  { %260 = vst.msk [vmem:[#allocation2] sm:$0x3] %vm259_vm3, %v257_v34  ;;  %2183 = vmatmul.mubr.msk.f32.vlgmr.msra.gmra.mrb[2].mxu0 %vm156_vm4, %v257_v34 }
 0x2e5   :  { %2381 = vmatpush3.bf16.msra.mxu0 %v2791_v9  ;;  %2204 = vmatprep.mubr.msk.f32.mxu0 %vm2687_vm0, %v2688_v2 }
 0x2e6   :  { %2382 = vmatprep.subr.bf16.mxu0 %v2686_v1 }
 0x2e9   :  { %2384 = vmatpush3.bf16.msra.mxu0 %v2798_v11 }
 0x2ea   :  { %2391 = vmatprep.subr.bf16.mxu0 %v2686_v1 }
 0x3b7   :  { %v330_v36 = vpop.f32.mrb[2].mxu0 }
 0x3b8   :  { %v334_v37 = vadd.f32 %v330_v36, %v261_v35  ;;  %v2184_v38 = vpop.f32.mrb[3].mxu0 }
 0x3ba   :  { %2491 = vtanh.f32 %v334_v37  ;;  %v2031_v40 = vmul.f32 -1.442695, %v334_v37 }
 0x3bc   :  { %2493 = vpow2.f32 %v2031_v40 }
 0x3c4   :  { %v2492_v39 = vpop.eup %2491 }
 0x3c5   :  { %344 = vrot.lane.b32.xlu0 %v2492_v39, %s2689_s25 }
 0x3c6   :  { %v2494_v41 = vpop.eup %2493 }
 0x3c7   :  { %v338_v42 = vadd.f32 1.0, %v2494_v41 }
 0x3c9   :  { %2495 = vrcp.f32 %v338_v42 }
 0x3d3   :  { %v2496_v43 = vpop.eup %2495 }
 0x3d4   :  { %v342_v46 = vmul.f32 %v2496_v43, %v248_v30 }
 0x437   :  { %v345_v44 = vpop.permute.xlu0 %344 }
 0x438   :  { %v347_v45 = vmul.f32 %v2496_v43, %v345_v44 }
 0x43a   :  { %349 = vrot.lane.b32.xlu1 %v347_v45, %s2690_s3 }
 0x4ac   :  { %v350_v47 = vpop.permute.xlu1 %349 }
 0x4ad   :  { %v352_v48 = vadd.f32 %v350_v47, %v342_v46  ;;  %v673_v47 = vld [vmem:[#allocation3 + $0xa] sm:$0x3] }
 0x4af   :  { %2497 = vtanh.f32 %v352_v48 }
 0x4b9   :  { %v2498_v49 = vpop.eup %2497 }
 0x4ba   :  { %355 = vrot.lane.b32.xlu0 %v2498_v49, %s2689_s25 }
 0x52c   :  { %v356_v50 = vpop.permute.xlu0 %355 }
 0x52d   :  { %v358_v51 = vmul.f32 %v2496_v43, %v356_v50 }
 0x52f   :  { %360 = vrot.lane.b32.xlu1 %v358_v51, %s2690_s3 }
 0x5a1   :  { %v361_v52 = vpop.permute.xlu1 %360 }
 0x5a2   :  { %363 = vst.msk [vmem:[#allocation2 + $0x2] sm:$0x3] %vm259_vm3, %v361_v52  ;;  %2194 = vmatmul.mubr.msk.f32.vlgmr.msra.gmra.mrb[2].mxu1 %vm156_vm4, %v361_v52 }
 0x5a3   :  { %2387 = vmatpush3.bf16.msra.mxu1 %v2791_v9  ;;  %2215 = vmatprep.mubr.msk.f32.mxu1 %vm2687_vm0, %v2688_v2 }
 0x5a4   :  { %2388 = vmatprep.subr.bf16.mxu1 %v2686_v1 }
 0x5a7   :  { %2390 = vmatpush3.bf16.msra.mxu1 %v2798_v11 }
 0x5a8   :  { %2397 = vmatprep.subr.bf16.mxu1 %v2686_v1 }
 0x675   :  { %v433_v54 = vpop.f32.mrb[2].mxu1 }
 0x676   :  { %v437_v55 = vadd.f32 %v433_v54, %v364_v53  ;;  %v2195_v56 = vpop.f32.mrb[3].mxu1 }
 0x678   :  { %2499 = vtanh.f32 %v437_v55  ;;  %v2033_v58 = vmul.f32 -1.442695, %v437_v55 }
 0x67a   :  { %2501 = vpow2.f32 %v2033_v58 }
 0x682   :  { %v2500_v57 = vpop.eup %2499 }
 0x683   :  { %447 = vrot.lane.b32.xlu0 %v2500_v57, %s2689_s25 }
 0x684   :  { %v2502_v59 = vpop.eup %2501 }
 0x685   :  { %v441_v60 = vadd.f32 1.0, %v2502_v59 }
 0x687   :  { %2503 = vrcp.f32 %v441_v60 }
 0x691   :  { %v2504_v61 = vpop.eup %2503 }
 0x692   :  { %v445_v0 = vmul.f32 %v2504_v61, %v352_v48 }
 0x6f5   :  { %v448_v62 = vpop.permute.xlu0 %447 }
 0x6f6   :  { %v450_v63 = vmul.f32 %v2504_v61, %v448_v62 }
 0x6f8   :  { %452 = vrot.lane.b32.xlu1 %v450_v63, %s2690_s3 }
 0x76a   :  { %v453_v3 = vpop.permute.xlu1 %452 }
 0x76b   :  { %v455_v4 = vadd.f32 %v453_v3, %v445_v0  ;;  %v776_v0 = vld [vmem:[#allocation3 + $0xc] sm:$0x3] }
 0x76d   :  { %2505 = vtanh.f32 %v455_v4 }
 0x777   :  { %v2506_v5 = vpop.eup %2505 }
 0x778   :  { %458 = vrot.lane.b32.xlu0 %v2506_v5, %s2689_s25 }
 0x7ea   :  { %v459_v6 = vpop.permute.xlu0 %458 }
 0x7eb   :  { %v461_v7 = vmul.f32 %v2504_v61, %v459_v6 }
 0x7ed   :  { %463 = vrot.lane.b32.xlu1 %v461_v7, %s2690_s3 }
 0x85f   :  { %v464_v8 = vpop.permute.xlu1 %463 }
 0x860   :  { %466 = vst.msk [vmem:[#allocation2 + $0x4] sm:$0x3] %vm259_vm3, %v464_v8  ;;  %2205 = vmatmul.mubr.msk.f32.vlgmr.msra.gmra.mrb[4].mxu0 %vm156_vm4, %v464_v8 }
 0x861   :  { %2393 = vmatpush3.bf16.msra.mxu0 %v2791_v9  ;;  %2226 = vmatprep.mubr.msk.f32.mxu0 %vm2687_vm0, %v2688_v2 }
 0x862   :  { %2394 = vmatprep.subr.bf16.mxu0 %v2686_v1 }
 0x865   :  { %2396 = vmatpush3.bf16.msra.mxu0 %v2798_v11 }
 0x866   :  { %2403 = vmatprep.subr.bf16.mxu0 %v2686_v1 }
 0x933   :  { %v536_v12 = vpop.f32.mrb[4].mxu0 }
 0x934   :  { %v540_v13 = vadd.f32 %v536_v12, %v467_v10  ;;  %v2206_v14 = vpop.f32.mrb[5].mxu0 }
 0x936   :  { %2507 = vtanh.f32 %v540_v13  ;;  %v2035_v16 = vmul.f32 -1.442695, %v540_v13 }
 0x938   :  { %2509 = vpow2.f32 %v2035_v16 }
 0x940   :  { %v2508_v15 = vpop.eup %2507 }
 0x941   :  { %550 = vrot.lane.b32.xlu0 %v2508_v15, %s2689_s25 }
 0x942   :  { %v2510_v17 = vpop.eup %2509 }
 0x943   :  { %v544_v18 = vadd.f32 1.0, %v2510_v17 }
 0x945   :  { %2511 = vrcp.f32 %v544_v18 }
 0x94f   :  { %v2512_v19 = vpop.eup %2511 }
 0x950   :  { %v548_v22 = vmul.f32 %v2512_v19, %v455_v4 }
 0x9b3   :  { %v551_v20 = vpop.permute.xlu0 %550 }
 0x9b4   :  { %v553_v21 = vmul.f32 %v2512_v19, %v551_v20 }
 0x9b6   :  { %555 = vrot.lane.b32.xlu1 %v553_v21, %s2690_s3 }
 0xa28   :  { %v556_v23 = vpop.permute.xlu1 %555 }
 0xa29   :  { %v558_v24 = vadd.f32 %v556_v23, %v548_v22  ;;  %v879_v22 = vld [vmem:[#allocation3 + $0xe] sm:$0x3] }
 0xa2b   :  { %2513 = vtanh.f32 %v558_v24 }
 0xa35   :  { %v2514_v25 = vpop.eup %2513 }
 0xa36   :  { %561 = vrot.lane.b32.xlu0 %v2514_v25, %s2689_s25 }
 0xaa8   :  { %v562_v26 = vpop.permute.xlu0 %561 }
 0xaa9   :  { %v564_v27 = vmul.f32 %v2512_v19, %v562_v26 }
 0xaab   :  { %566 = vrot.lane.b32.xlu1 %v564_v27, %s2690_s3 }
 0xb1d   :  { %v567_v28 = vpop.permute.xlu1 %566 }
 0xb1e   :  { %569 = vst.msk [vmem:[#allocation2 + $0x6] sm:$0x3] %vm259_vm3, %v567_v28  ;;  %2216 = vmatmul.mubr.msk.f32.vlgmr.msra.gmra.mrb[4].mxu1 %vm156_vm4, %v567_v28 }
 0xb1f   :  { %2399 = vmatpush3.bf16.msra.mxu1 %v2791_v9  ;;  %2237 = vmatprep.mubr.msk.f32.mxu1 %vm2687_vm0, %v2688_v2 }
 0xb20   :  { %2400 = vmatprep.subr.bf16.mxu1 %v2686_v1 }
 0xb23   :  { %2402 = vmatpush3.bf16.msra.mxu1 %v2798_v11 }
 0xb25   :  { %v988_v63 = vld [vmem:[#allocation2] sm:$0xff] }
 0xbf1   :  { %v639_v30 = vpop.f32.mrb[4].mxu1 }
 0xbf2   :  { %v643_v31 = vadd.f32 %v639_v30, %v570_v29  ;;  %v2217_v32 = vpop.f32.mrb[5].mxu1 }
 0xbf4   :  { %2515 = vtanh.f32 %v643_v31  ;;  %v2037_v34 = vmul.f32 -1.442695, %v643_v31 }
 0xbf6   :  { %2517 = vpow2.f32 %v2037_v34 }
 0xbfe   :  { %v2516_v33 = vpop.eup %2515 }
 0xbff   :  { %653 = vrot.lane.b32.xlu0 %v2516_v33, %s2689_s25 }
 0xc00   :  { %v2518_v35 = vpop.eup %2517 }
 0xc01   :  { %v647_v36 = vadd.f32 1.0, %v2518_v35 }
 0xc03   :  { %2519 = vrcp.f32 %v647_v36 }
 0xc0d   :  { %v2520_v37 = vpop.eup %2519 }
 0xc0e   :  { %v651_v40 = vmul.f32 %v2520_v37, %v558_v24 }
 0xc71   :  { %v654_v38 = vpop.permute.xlu0 %653 }
 0xc72   :  { %v656_v39 = vmul.f32 %v2520_v37, %v654_v38  ;;  %v991_v38 = vld [vmem:[%s3063_s4 + $0x8] sm:$0xff] }
 0xc74   :  { %658 = vrot.lane.b32.xlu1 %v656_v39, %s2690_s3 }
 0xce6   :  { %v659_v41 = vpop.permute.xlu1 %658 }
 0xce7   :  { %v661_v42 = vadd.f32 %v659_v41, %v651_v40  ;;  %v992_v40 = vld [vmem:[%s3063_s4 + $0x10] sm:$0xff]  ;;  %v993_v41 = vld [vmem:[%s3063_s4 + $0x18] sm:$0xff] }
 0xce9   :  { %2521 = vtanh.f32 %v661_v42 }
 0xcf3   :  { %v2522_v43 = vpop.eup %2521 }
 0xcf4   :  { %664 = vrot.lane.b32.xlu0 %v2522_v43, %s2689_s25  ;;  %v1084_v43 = vld [vmem:[#allocation5] sm:$0xff] }
 0xd66   :  { %v665_v44 = vpop.permute.xlu0 %664 }
 0xd67   :  { %v667_v45 = vmul.f32 %v2520_v37, %v665_v44  ;;  %v990_v37 = vld [vmem:[%s3063_s4] sm:$0xff]  ;;  %v1085_v44 = vld [vmem:[#allocation5 + $0x8] sm:$0xff] }
 0xd68   :  { %v2409_v39 = vpack.c.bf16 %v991_v38, %v990_v37 }
 0xd69   :  { %669 = vrot.lane.b32.xlu1 %v667_v45, %s2690_s3  ;;  %v1086_v45 = vld [vmem:[#allocation5 + $0x10] sm:$0xff] }
 0xd6a   :  { %2410 = vmatprep.subr.bf16.mxu1 %v2409_v39 }
 0xddb   :  { %v670_v46 = vpop.permute.xlu1 %669 }
 0xddc   :  { %672 = vst.msk [vmem:[#allocation2 + $0x8] sm:$0x3] %vm259_vm3, %v670_v46  ;;  %2227 = vmatmul.mubr.msk.f32.vlgmr.msra.gmra.mrb[6].mxu0 %vm156_vm4, %v670_v46  ;;  %v2912_v46 = vpack.c.bf16 %v1085_v44, %v1084_v43 }
 0xddd   :  { %2405 = vmatpush3.bf16.msra.mxu0 %v2791_v9  ;;  %2248 = vmatprep.mubr.msk.f32.mxu0 %vm2687_vm0, %v2688_v2 }
 0xdde   :  { %2406 = vmatprep.subr.bf16.mxu0 %v2686_v1 }
 0xde1   :  { %2408 = vmatpush3.bf16.msra.mxu0 %v2798_v11 }
 0xde2   :  { %2417 = vmatprep.subr.bf16.mxu0 %v2686_v1 }
 0xeaf   :  { %v742_v48 = vpop.f32.mrb[6].mxu0 }
 0xeb0   :  { %v746_v49 = vadd.f32 %v742_v48, %v673_v47  ;;  %v2228_v50 = vpop.f32.mrb[7].mxu0  ;;  %v1087_v47 = vld [vmem:[#allocation5 + $0x18] sm:$0xff] }
 0xeb1   :  { %v2915_v50 = vpack.c.bf16 %v1087_v47, %v1086_v45 }
 0xeb2   :  { %2523 = vtanh.f32 %v746_v49  ;;  %v2039_v52 = vmul.f32 -1.442695, %v746_v49 }
 0xeb4   :  { %2525 = vpow2.f32 %v2039_v52 }
 0xebc   :  { %v2524_v51 = vpop.eup %2523 }
 0xebd   :  { %756 = vrot.lane.b32.xlu0 %v2524_v51, %s2689_s25 }
 0xebe   :  { %v2526_v9 = vpop.eup %2525 }
 0xebf   :  { %v750_v53 = vadd.f32 1.0, %v2526_v9 }
 0xec1   :  { %2527 = vrcp.f32 %v750_v53 }
 0xecb   :  { %v2528_v54 = vpop.eup %2527 }
 0xecc   :  { %v754_v11 = vmul.f32 %v2528_v54, %v661_v42  ;;  %v2413_v42 = vpack.c.bf16 %v993_v41, %v992_v40 }
 0xf2f   :  { %v757_v55 = vpop.permute.xlu0 %756 }
 0xf30   :  { %v759_v56 = vmul.f32 %v2528_v54, %v757_v55 }
 0xf32   :  { %761 = vrot.lane.b32.xlu1 %v759_v56, %s2690_s3 }
 0xfa4   :  { %v762_v57 = vpop.permute.xlu1 %761 }
 0xfa5   :  { %v764_v58 = vadd.f32 %v762_v57, %v754_v11 }
 0xfa7   :  { %2529 = vtanh.f32 %v764_v58 }
 0xfb1   :  { %v2530_v59 = vpop.eup %2529 }
 0xfb2   :  { %767 = vrot.lane.b32.xlu0 %v2530_v59, %s2689_s25 }
0x1024   :  { %v768_v60 = vpop.permute.xlu0 %767 }
0x1025   :  { %v770_v61 = vmul.f32 %v2528_v54, %v768_v60  ;;  %v2044_v54 = vld [vmem:[%s3065_s6] ss:$0 sm:$0xff] }
0x1027   :  { %772 = vrot.lane.b32.xlu1 %v770_v61, %s2690_s3 }
0x1099   :  { %v773_v62 = vpop.permute.xlu1 %772 }
0x109a   :  { %775 = vst.msk [vmem:[#allocation2 + $0xa] sm:$0x3] %vm259_vm3, %v773_v62  ;;  %2238 = vmatmul.mubr.msk.f32.vlgmr.msra.gmra.mrb[6].mxu1 %vm156_vm4, %v773_v62 }
0x109b   :  { %2259 = vmatprep.mubr.msk.f32.mxu1 %vm156_vm4, %v988_v63  ;;  %2412 = vmatpush3.bf16.msra.mxu1 %v2409_v39 }
0x109c   :  { %2414 = vmatprep.subr.bf16.mxu1 %v2413_v42 }
0x109f   :  { %2416 = vmatpush3.bf16.msra.mxu1 %v2413_v42 }
0x10a0   :  { %2423 = vmatprep.subr.bf16.mxu1 %v2686_v1 }
0x116d   :  { %v845_v3 = vpop.f32.mrb[6].mxu1 }
0x116e   :  { %v849_v4 = vadd.f32 %v845_v3, %v776_v0  ;;  %v2239_v5 = vpop.f32.mrb[7].mxu1 }
0x1170   :  { %2531 = vtanh.f32 %v849_v4  ;;  %v2041_v7 = vmul.f32 -1.442695, %v849_v4 }
0x1172   :  { %2533 = vpow2.f32 %v2041_v7 }
0x117a   :  { %v2532_v6 = vpop.eup %2531 }
0x117b   :  { %859 = vrot.lane.b32.xlu0 %v2532_v6, %s2689_s25 }
0x117c   :  { %v2534_v8 = vpop.eup %2533 }
0x117d   :  { %v853_v10 = vadd.f32 1.0, %v2534_v8 }
0x117f   :  { %2535 = vrcp.f32 %v853_v10 }
0x1189   :  { %v2536_v12 = vpop.eup %2535 }
0x118a   :  { %v857_v15 = vmul.f32 %v2536_v12, %v764_v58 }
0x11ed   :  { %v860_v13 = vpop.permute.xlu0 %859 }
0x11ee   :  { %v862_v14 = vmul.f32 %v2536_v12, %v860_v13 }
0x11f0   :  { %864 = vrot.lane.b32.xlu1 %v862_v14, %s2690_s3 }
0x1262   :  { %v865_v16 = vpop.permute.xlu1 %864 }
0x1263   :  { %v867_v17 = vadd.f32 %v865_v16, %v857_v15 }
0x1265   :  { %2537 = vtanh.f32 %v867_v17 }
0x126f   :  { %v2538_v18 = vpop.eup %2537 }
0x1270   :  { %870 = vrot.lane.b32.xlu0 %v2538_v18, %s2689_s25 }
0x12e2   :  { %v871_v19 = vpop.permute.xlu0 %870 }
0x12e3   :  { %v873_v20 = vmul.f32 %v2536_v12, %v871_v19 }
0x12e5   :  { %875 = vrot.lane.b32.xlu1 %v873_v20, %s2690_s3 }
0x1357   :  { %v876_v21 = vpop.permute.xlu1 %875 }
0x1358   :  { %878 = vst.msk [vmem:[#allocation2 + $0xc] sm:$0x3] %vm259_vm3, %v876_v21  ;;  %2249 = vmatmul.mubr.msk.f32.vlgmr.msra.gmra.mrb[8].mxu0 %vm156_vm4, %v876_v21 }
0x1359   :  { %2270 = vmatprep.mubr.msk.f32.mxu0 %vm2687_vm0, %v2688_v2  ;;  %2419 = vmatpush3.bf16.msra.mxu0 %v2912_v46 }
0x135a   :  { %2420 = vmatprep.subr.bf16.mxu0 %v2686_v1 }
0x135d   :  { %2422 = vmatpush3.bf16.msra.mxu0 %v2915_v50 }
0x135e   :  { %2429 = vmatprep.subr.bf16.mxu0 %v2686_v1 }
0x1360   :  { %2271 = vmatmul.mubr.f32.vlgmr.msra.gmra.mrb[10].mxu0 %v2688_v2 }
0x1361   :  { %2431 = vmatpush3.bf16.msra.mxu0 %v2912_v46  ;;  %2292 = vmatprep.mubr.msk.f32.mxu0 %vm2687_vm0, %v2688_v2 }
0x1362   :  { %2432 = vmatprep.subr.bf16.mxu0 %v2686_v1 }
0x1365   :  { %2434 = vmatpush3.bf16.msra.mxu0 %v2915_v50 }
0x1366   :  { %2441 = vmatprep.subr.bf16.mxu0 %v2686_v1 }
0x142b   :  { %v948_v23 = vpop.f32.mrb[8].mxu0 }
0x142c   :  { %v952_v24 = vadd.f32 %v948_v23, %v879_v22  ;;  %v2250_v25 = vpop.f32.mrb[9].mxu0 }
0x142e   :  { %2539 = vtanh.f32 %v952_v24  ;;  %v2043_v27 = vmul.f32 -1.442695, %v952_v24 }
0x1430   :  { %2541 = vpow2.f32 %v2043_v27 }
0x1433   :  { %v1155_v9 = vpop.f32.mrb[10].mxu0 }
0x1434   :  { %v2272_v53 = vpop.f32.mrb[11].mxu0 }
0x1438   :  { %v2540_v26 = vpop.eup %2539 }
0x1439   :  { %962 = vrot.lane.b32.xlu0 %v2540_v26, %s2689_s25 }
0x143a   :  { %v2542_v28 = vpop.eup %2541 }
0x143b   :  { %v956_v29 = vadd.f32 1.0, %v2542_v28 }
0x143d   :  { %2543 = vrcp.f32 %v956_v29 }
0x1447   :  { %v2544_v30 = vpop.eup %2543 }
0x1448   :  { %v960_v33 = vmul.f32 %v2544_v30, %v867_v17 }
0x14ab   :  { %v963_v31 = vpop.permute.xlu0 %962 }
0x14ac   :  { %v965_v32 = vmul.f32 %v2544_v30, %v963_v31 }
0x14ae   :  { %967 = vrot.lane.b32.xlu1 %v965_v32, %s2690_s3 }
0x1520   :  { %v968_v34 = vpop.permute.xlu1 %967 }
0x1521   :  { %v2895_v35 = vadd.f32 %v968_v34, %v960_v33 }
0x1523   :  { %2545 = vtanh.f32 %v2895_v35 }
0x152d   :  { %v2546_v36 = vpop.eup %2545 }
0x152e   :  { %973 = vrot.lane.b32.xlu0 %v2546_v36, %s2689_s25 }
0x15a0   :  { %v974_v48 = vpop.permute.xlu0 %973 }
0x15a1   :  { %v976_v49 = vmul.f32 %v2544_v30, %v974_v48 }
0x15a3   :  { %978 = vrot.lane.b32.xlu1 %v976_v49, %s2690_s3 }
0x1615   :  { %v979_v51 = vpop.permute.xlu1 %978 }
0x1616   :  { %981 = vst.msk [vmem:[#allocation2 + $0xe] sm:$0x3] %vm259_vm3, %v979_v51  ;;  %982 = vst.msk [vmem:[#allocation8] sm:$0x3] %vm259_vm3, %v979_v51 }
0x161d   :  { %v989_v52 = vld [vmem:[#allocation2 + $0x8] sm:$0xff] }
0x161e   :  { %2260 = vmatmul.mubr.msk.f32.vlgmr.msra.gmra.mrb[8].mxu1 %vm156_vm4, %v989_v52 }
0x161f   :  { %2425 = vmatpush3.bf16.msra.mxu1 %v2912_v46  ;;  %2281 = vmatprep.mubr.msk.f32.mxu1 %vm2687_vm0, %v2688_v2 }
0x1620   :  { %2426 = vmatprep.subr.bf16.mxu1 %v2686_v1 }
0x1623   :  { %2428 = vmatpush3.bf16.msra.mxu1 %v2915_v50 }
0x1624   :  { %2435 = vmatprep.subr.bf16.mxu1 %v2686_v1 }
0x16f1   :  { %v2261_v55 = vpop.f32.mrb[8].mxu1 }
0x16f2   :  { %v1079_v56 = vadd.f32 %v2261_v55, %v2044_v54  ;;  %v1073_v11 = vpop.f32.mrb[9].mxu1 }
0x16f3   :  { %v1074_v57 = vadd.f32 %v2044_v54, %v1073_v11 }
0x16f4   :  { %1083 = vst [vmem:[#allocation3 + $0x8] sm:$0xff] %v1079_v56 }
0x16f5   :  { %1082 = vst [vmem:[#allocation3] sm:$0xff] %v1074_v57 }
0x16fc   :  { %v1088_v58 = vld [vmem:[#allocation3] sm:$0x3]  ;;  %v1184_v14 = vld [vmem:[#allocation3 + $0x2] sm:$0x3]  ;;  %v1285_v32 = vld [vmem:[#allocation3 + $0x4] sm:$0x3] }
0x16fd   :  { %v1159_v59 = vadd.f32 %v1155_v9, %v1088_v58  ;;  %v1386_v9 = vld [vmem:[#allocation3 + $0x6] sm:$0x3] }
0x16ff   :  { %2547 = vtanh.f32 %v1159_v59  ;;  %v2047_v61 = vmul.f32 -1.442695, %v1159_v59 }
0x1701   :  { %2549 = vpow2.f32 %v2047_v61 }
0x1709   :  { %v2548_v60 = vpop.eup %2547 }
0x170a   :  { %1169 = vrot.lane.b32.xlu0 %v2548_v60, %s2689_s25 }
0x170b   :  { %v2550_v62 = vpop.eup %2549 }
0x170c   :  { %v1163_v63 = vadd.f32 1.0, %v2550_v62 }
0x170e   :  { %2551 = vrcp.f32 %v1163_v63 }
0x1718   :  { %v2552_v0 = vpop.eup %2551 }
0x1719   :  { %v1167_v5 = vmul.f32 0.0, %v2552_v0 }
0x177c   :  { %v1170_v3 = vpop.permute.xlu0 %1169 }
0x177d   :  { %v1172_v4 = vmul.f32 %v2552_v0, %v1170_v3 }
0x177f   :  { %1174 = vrot.lane.b32.xlu1 %v1172_v4, %s2690_s3 }
0x17f1   :  { %v1175_v6 = vpop.permute.xlu1 %1174 }
0x17f2   :  { %v1177_v7 = vadd.f32 %v1175_v6, %v1167_v5 }
0x17f4   :  { %2553 = vtanh.f32 %v1177_v7 }
0x17fe   :  { %v2554_v8 = vpop.eup %2553 }
0x17ff   :  { %1180 = vrot.lane.b32.xlu0 %v2554_v8, %s2689_s25 }
0x1871   :  { %v1181_v10 = vpop.permute.xlu0 %1180 }
0x1872   :  { %v1183_v12 = vmul.f32 %v2552_v0, %v1181_v10 }
0x1874   :  { %1186 = vrot.lane.b32.xlu1 %v1183_v12, %s2690_s3 }
0x18e6   :  { %v1187_v13 = vpop.permute.xlu1 %1186 }
0x18e7   :  { %2282 = vmatmul.mubr.msk.f32.vlgmr.msra.gmra.mrb[10].mxu1 %vm156_vm4, %v1187_v13 }
0x18e8   :  { %2437 = vmatpush3.bf16.msra.mxu1 %v2912_v46  ;;  %2303 = vmatprep.mubr.msk.f32.mxu1 %vm2687_vm0, %v2688_v2 }
0x18e9   :  { %2438 = vmatprep.subr.bf16.mxu1 %v2686_v1 }
0x18ec   :  { %2440 = vmatpush3.bf16.msra.mxu1 %v2915_v50 }
0x18ed   :  { %2447 = vmatprep.subr.bf16.mxu1 %v2686_v1 }
0x19ba   :  { %v1256_v15 = vpop.f32.mrb[10].mxu1 }
0x19bb   :  { %v1260_v16 = vadd.f32 %v1256_v15, %v1184_v14  ;;  %v2283_v17 = vpop.f32.mrb[11].mxu1 }
0x19bd   :  { %2555 = vtanh.f32 %v1260_v16  ;;  %v2049_v19 = vmul.f32 -1.442695, %v1260_v16 }
0x19bf   :  { %2557 = vpow2.f32 %v2049_v19 }
0x19c7   :  { %v2556_v18 = vpop.eup %2555 }
0x19c8   :  { %1270 = vrot.lane.b32.xlu0 %v2556_v18, %s2689_s25 }
0x19c9   :  { %v2558_v20 = vpop.eup %2557 }
0x19ca   :  { %v1264_v21 = vadd.f32 1.0, %v2558_v20 }
0x19cc   :  { %2559 = vrcp.f32 %v1264_v21 }
0x19d6   :  { %v2560_v22 = vpop.eup %2559 }
0x19d7   :  { %v1268_v25 = vmul.f32 %v2560_v22, %v1177_v7  ;;  %v1487_v7 = vld [vmem:[#allocation3 + $0x8] sm:$0x3] }
0x1a3a   :  { %v1271_v23 = vpop.permute.xlu0 %1270 }
0x1a3b   :  { %v1273_v24 = vmul.f32 %v2560_v22, %v1271_v23 }
0x1a3d   :  { %1275 = vrot.lane.b32.xlu1 %v1273_v24, %s2690_s3 }
0x1aaf   :  { %v1276_v26 = vpop.permute.xlu1 %1275 }
0x1ab0   :  { %v1278_v27 = vadd.f32 %v1276_v26, %v1268_v25 }
0x1ab2   :  { %2561 = vtanh.f32 %v1278_v27 }
0x1abc   :  { %v2562_v28 = vpop.eup %2561 }
0x1abd   :  { %1281 = vrot.lane.b32.xlu0 %v2562_v28, %s2689_s25 }
0x1b2f   :  { %v1282_v29 = vpop.permute.xlu0 %1281 }
0x1b30   :  { %v1284_v30 = vmul.f32 %v2560_v22, %v1282_v29 }
0x1b32   :  { %1287 = vrot.lane.b32.xlu1 %v1284_v30, %s2690_s3 }
0x1ba4   :  { %v1288_v31 = vpop.permute.xlu1 %1287 }
0x1ba5   :  { %2293 = vmatmul.mubr.msk.f32.vlgmr.msra.gmra.mrb[12].mxu0 %vm156_vm4, %v1288_v31 }
0x1ba6   :  { %2443 = vmatpush3.bf16.msra.mxu0 %v2912_v46  ;;  %2314 = vmatprep.mubr.msk.f32.mxu0 %vm2687_vm0, %v2688_v2 }
0x1ba7   :  { %2444 = vmatprep.subr.bf16.mxu0 %v2686_v1 }
0x1baa   :  { %2446 = vmatpush3.bf16.msra.mxu0 %v2915_v50 }
0x1bab   :  { %2453 = vmatprep.subr.bf16.mxu0 %v2686_v1 }
0x1c78   :  { %v1357_v33 = vpop.f32.mrb[12].mxu0 }
0x1c79   :  { %v1361_v34 = vadd.f32 %v1357_v33, %v1285_v32  ;;  %v2294_v36 = vpop.f32.mrb[13].mxu0 }
0x1c7b   :  { %2563 = vtanh.f32 %v1361_v34  ;;  %v2051_v38 = vmul.f32 -1.442695, %v1361_v34 }
0x1c7d   :  { %2565 = vpow2.f32 %v2051_v38 }
0x1c85   :  { %v2564_v37 = vpop.eup %2563 }
0x1c86   :  { %1371 = vrot.lane.b32.xlu0 %v2564_v37, %s2689_s25 }
0x1c87   :  { %v2566_v39 = vpop.eup %2565 }
0x1c88   :  { %v1365_v40 = vadd.f32 1.0, %v2566_v39 }
0x1c8a   :  { %2567 = vrcp.f32 %v1365_v40 }
0x1c94   :  { %v2568_v41 = vpop.eup %2567 }
0x1c95   :  { %v1369_v44 = vmul.f32 %v2568_v41, %v1278_v27  ;;  %v1588_v27 = vld [vmem:[#allocation3 + $0xa] sm:$0x3] }
0x1cf8   :  { %v1372_v42 = vpop.permute.xlu0 %1371 }
0x1cf9   :  { %v1374_v43 = vmul.f32 %v2568_v41, %v1372_v42 }
0x1cfb   :  { %1376 = vrot.lane.b32.xlu1 %v1374_v43, %s2690_s3 }
0x1d6d   :  { %v1377_v45 = vpop.permute.xlu1 %1376 }
0x1d6e   :  { %v1379_v47 = vadd.f32 %v1377_v45, %v1369_v44  ;;  %v1689_v44 = vld [vmem:[#allocation3 + $0xc] sm:$0x3] }
0x1d70   :  { %2569 = vtanh.f32 %v1379_v47 }
0x1d7a   :  { %v2570_v48 = vpop.eup %2569 }
0x1d7b   :  { %1382 = vrot.lane.b32.xlu0 %v2570_v48, %s2689_s25 }
0x1ded   :  { %v1383_v49 = vpop.permute.xlu0 %1382 }
0x1dee   :  { %v1385_v51 = vmul.f32 %v2568_v41, %v1383_v49 }
0x1df0   :  { %1388 = vrot.lane.b32.xlu1 %v1385_v51, %s2690_s3 }
0x1e62   :  { %v1389_v52 = vpop.permute.xlu1 %1388 }
0x1e63   :  { %2304 = vmatmul.mubr.msk.f32.vlgmr.msra.gmra.mrb[12].mxu1 %vm156_vm4, %v1389_v52 }
0x1e64   :  { %2449 = vmatpush3.bf16.msra.mxu1 %v2912_v46  ;;  %2325 = vmatprep.mubr.msk.f32.mxu1 %vm2687_vm0, %v2688_v2 }
0x1e65   :  { %2450 = vmatprep.subr.bf16.mxu1 %v2686_v1 }
0x1e68   :  { %2452 = vmatpush3.bf16.msra.mxu1 %v2915_v50 }
0x1e69   :  { %2459 = vmatprep.subr.bf16.mxu1 %v2686_v1 }
0x1f36   :  { %v1458_v53 = vpop.f32.mrb[12].mxu1 }
0x1f37   :  { %v1462_v54 = vadd.f32 %v1458_v53, %v1386_v9  ;;  %v2305_v55 = vpop.f32.mrb[13].mxu1 }
0x1f39   :  { %2571 = vtanh.f32 %v1462_v54  ;;  %v2053_v11 = vmul.f32 -1.442695, %v1462_v54 }
0x1f3b   :  { %2573 = vpow2.f32 %v2053_v11 }
0x1f43   :  { %v2572_v56 = vpop.eup %2571 }
0x1f44   :  { %1472 = vrot.lane.b32.xlu0 %v2572_v56, %s2689_s25 }
0x1f45   :  { %v2574_v57 = vpop.eup %2573 }
0x1f46   :  { %v1466_v58 = vadd.f32 1.0, %v2574_v57 }
0x1f48   :  { %2575 = vrcp.f32 %v1466_v58 }
0x1f52   :  { %v2576_v59 = vpop.eup %2575 }
0x1f53   :  { %v1470_v62 = vmul.f32 %v2576_v59, %v1379_v47 }
0x1fb6   :  { %v1473_v60 = vpop.permute.xlu0 %1472 }
0x1fb7   :  { %v1475_v61 = vmul.f32 %v2576_v59, %v1473_v60 }
0x1fb9   :  { %1477 = vrot.lane.b32.xlu1 %v1475_v61, %s2690_s3  ;;  %v1790_v61 = vld [vmem:[#allocation3 + $0xe] sm:$0x3] }
0x202b   :  { %v1478_v63 = vpop.permute.xlu1 %1477 }
0x202c   :  { %v1480_v0 = vadd.f32 %v1478_v63, %v1470_v62 }
0x202e   :  { %2577 = vtanh.f32 %v1480_v0 }
0x2038   :  { %v2578_v3 = vpop.eup %2577 }
0x2039   :  { %1483 = vrot.lane.b32.xlu0 %v2578_v3, %s2689_s25 }
0x20ab   :  { %v1484_v4 = vpop.permute.xlu0 %1483 }
0x20ac   :  { %v1486_v5 = vmul.f32 %v2576_v59, %v1484_v4 }
0x20ae   :  { %1489 = vrot.lane.b32.xlu1 %v1486_v5, %s2690_s3 }
0x2120   :  { %v1490_v6 = vpop.permute.xlu1 %1489 }
0x2121   :  { %2315 = vmatmul.mubr.msk.f32.vlgmr.msra.gmra.mrb[14].mxu0 %vm156_vm4, %v1490_v6 }
0x2122   :  { %2455 = vmatpush3.bf16.msra.mxu0 %v2912_v46  ;;  %2336 = vmatprep.mubr.msk.f32.mxu0 %vm2687_vm0, %v2688_v2 }
0x2123   :  { %2456 = vmatprep.subr.bf16.mxu0 %v2686_v1 }
0x2126   :  { %2458 = vmatpush3.bf16.msra.mxu0 %v2915_v50 }
0x2127   :  { %2465 = vmatprep.subr.bf16.mxu0 %v2686_v1 }
0x21f4   :  { %v1559_v8 = vpop.f32.mrb[14].mxu0 }
0x21f5   :  { %v1563_v10 = vadd.f32 %v1559_v8, %v1487_v7  ;;  %v2316_v12 = vpop.f32.mrb[15].mxu0 }
0x21f7   :  { %2579 = vtanh.f32 %v1563_v10  ;;  %v2055_v14 = vmul.f32 -1.442695, %v1563_v10 }
0x21f9   :  { %2581 = vpow2.f32 %v2055_v14 }
0x2201   :  { %v2580_v13 = vpop.eup %2579 }
0x2202   :  { %1573 = vrot.lane.b32.xlu0 %v2580_v13, %s2689_s25 }
0x2203   :  { %v2582_v15 = vpop.eup %2581 }
0x2204   :  { %v1567_v16 = vadd.f32 1.0, %v2582_v15  ;;  %v1903_v15 = vld [vmem:[%s3066_s7] sm:$0xff] }
0x2206   :  { %2583 = vrcp.f32 %v1567_v16  ;;  %v1904_v16 = vld [vmem:[%s3066_s7 + $0x8] sm:$0xff] }
0x2210   :  { %v2584_v17 = vpop.eup %2583 }
0x2211   :  { %v1571_v20 = vmul.f32 %v2584_v17, %v1480_v0 }
0x2274   :  { %v1574_v18 = vpop.permute.xlu0 %1573 }
0x2275   :  { %v1576_v19 = vmul.f32 %v2584_v17, %v1574_v18  ;;  %v2466_v18 = vpack.c.bf16 %v1904_v16, %v1903_v15 }
0x2277   :  { %1578 = vrot.lane.b32.xlu1 %v1576_v19, %s2690_s3  ;;  %v1906_v19 = vld [vmem:[%s3066_s7 + $0x18] sm:$0xff] }
0x22e9   :  { %v1579_v21 = vpop.permute.xlu1 %1578 }
0x22ea   :  { %v1581_v22 = vadd.f32 %v1579_v21, %v1571_v20 }
0x22ec   :  { %2585 = vtanh.f32 %v1581_v22 }
0x22f6   :  { %v2586_v23 = vpop.eup %2585 }
0x22f7   :  { %1584 = vrot.lane.b32.xlu0 %v2586_v23, %s2689_s25 }
0x2369   :  { %v1585_v24 = vpop.permute.xlu0 %1584 }
0x236a   :  { %v1587_v25 = vmul.f32 %v2584_v17, %v1585_v24  ;;  %v1905_v17 = vld [vmem:[%s3066_s7 + $0x10] sm:$0xff]  ;;  %s2692_s7 = smov [#allocation8]  }
0x236b   :  { %v2469_v20 = vpack.c.bf16 %v1906_v19, %v1905_v17  ;;  %s1995_s22 = sshll.u32 %s2692_s7, 4  ;;  %s1996_s22 = int_to_ptr.vmem [resolvable:$true] %s1995_s22 }
0x236c   :  { %1590 = vrot.lane.b32.xlu1 %v1587_v25, %s2690_s3  ;;  %s2633_s24 = scalar_lea.vmem %s1996_s22, 64  ;;  %p2638_p9 = scmp.lt.s32.totalorder %s1996_s22, %s1996_s22 }
0x236d   :  { %p2634_p8 = scmp.ne.s32.totalorder %s1996_s22, %s2633_s24  ;;  %p2639_p10 = scmp.lt.s32.totalorder %s2633_s24, %s2633_s24 }
0x236f   :  { %p2640_p11 = por %p2639_p10, %p2638_p9 }
0x2371   :  { %p2641_p12 = pnand %p2640_p11, %p2634_p8 }
0x23de   :  { %v1591_v26 = vpop.permute.xlu1 %1590 }
0x23df   :  { %2326 = vmatmul.mubr.msk.f32.vlgmr.msra.gmra.mrb[14].mxu1 %vm156_vm4, %v1591_v26 }
0x23e0   :  { %2461 = vmatpush3.bf16.msra.mxu1 %v2912_v46  ;;  %2347 = vmatprep.mubr.msk.f32.mxu1 %vm2687_vm0, %v2688_v2 }
0x23e1   :  { %2462 = vmatprep.subr.bf16.mxu1 %v2686_v1 }
0x23e4   :  { %2464 = vmatpush3.bf16.msra.mxu1 %v2915_v50 }
0x24b2   :  { %v1660_v28 = vpop.f32.mrb[14].mxu1 }
0x24b3   :  { %v1664_v29 = vadd.f32 %v1660_v28, %v1588_v27  ;;  %v2327_v30 = vpop.f32.mrb[15].mxu1 }
0x24b5   :  { %2587 = vtanh.f32 %v1664_v29  ;;  %v2057_v32 = vmul.f32 -1.442695, %v1664_v29 }
0x24b7   :  { %2589 = vpow2.f32 %v2057_v32 }
0x24bf   :  { %v2588_v31 = vpop.eup %2587 }
0x24c0   :  { %1674 = vrot.lane.b32.xlu0 %v2588_v31, %s2689_s25 }
0x24c1   :  { %v2590_v33 = vpop.eup %2589 }
0x24c2   :  { %v1668_v34 = vadd.f32 1.0, %v2590_v33 }
0x24c4   :  { %2591 = vrcp.f32 %v1668_v34 }
0x24ce   :  { %v2592_v46 = vpop.eup %2591 }
0x24cf   :  { %v1672_v38 = vmul.f32 %v2592_v46, %v1581_v22 }
0x2532   :  { %v1675_v36 = vpop.permute.xlu0 %1674 }
0x2533   :  { %v1677_v37 = vmul.f32 %v2592_v46, %v1675_v36 }
0x2535   :  { %1679 = vrot.lane.b32.xlu1 %v1677_v37, %s2690_s3 }
0x25a7   :  { %v1680_v50 = vpop.permute.xlu1 %1679 }
0x25a8   :  { %v1682_v39 = vadd.f32 %v1680_v50, %v1672_v38 }
0x25aa   :  { %2593 = vtanh.f32 %v1682_v39 }
0x25b4   :  { %v2594_v40 = vpop.eup %2593 }
0x25b5   :  { %1685 = vrot.lane.b32.xlu0 %v2594_v40, %s2689_s25 }
0x2627   :  { %v1686_v41 = vpop.permute.xlu0 %1685 }
0x2628   :  { %v1688_v42 = vmul.f32 %v2592_v46, %v1686_v41 }
0x262a   :  { %1691 = vrot.lane.b32.xlu1 %v1688_v42, %s2690_s3 }
0x269c   :  { %v1692_v43 = vpop.permute.xlu1 %1691 }
0x269d   :  { %2337 = vmatmul.mubr.msk.f32.vlgmr.msra.gmra.mrb[16].mxu0 %vm156_vm4, %v1692_v43 }
0x269e   :  { %2358 = vmatprep.mubr.msk.f32.mxu0 %vm2687_vm0, %v2688_v2  ;;  %2467 = vmatpush3.bf16.msra.mxu0 %v2466_v18 }
0x269f   :  { %2468 = vmatprep.subr.bf16.mxu0 %v2686_v1 }
0x26a2   :  { %2470 = vmatpush3.bf16.msra.mxu0 %v2469_v20 }
0x2770   :  { %v1761_v45 = vpop.f32.mrb[16].mxu0 }
0x2771   :  { %v1765_v47 = vadd.f32 %v1761_v45, %v1689_v44  ;;  %v2338_v48 = vpop.f32.mrb[17].mxu0 }
0x2773   :  { %2595 = vtanh.f32 %v1765_v47  ;;  %v2059_v51 = vmul.f32 -1.442695, %v1765_v47 }
0x2775   :  { %2597 = vpow2.f32 %v2059_v51 }
0x277d   :  { %v2596_v49 = vpop.eup %2595 }
0x277e   :  { %1775 = vrot.lane.b32.xlu0 %v2596_v49, %s2689_s25 }
0x277f   :  { %v2598_v52 = vpop.eup %2597 }
0x2780   :  { %v1769_v9 = vadd.f32 1.0, %v2598_v52 }
0x2782   :  { %2599 = vrcp.f32 %v1769_v9 }
0x278c   :  { %v2600_v53 = vpop.eup %2599 }
0x278d   :  { %v1773_v56 = vmul.f32 %v2600_v53, %v1682_v39 }
0x27f0   :  { %v1776_v54 = vpop.permute.xlu0 %1775 }
0x27f1   :  { %v1778_v55 = vmul.f32 %v2600_v53, %v1776_v54 }
0x27f3   :  { %1780 = vrot.lane.b32.xlu1 %v1778_v55, %s2690_s3 }
0x2865   :  { %v1781_v2 = vpop.permute.xlu1 %1780 }
0x2866   :  { %v1783_v11 = vadd.f32 %v1781_v2, %v1773_v56 }
0x2868   :  { %2601 = vtanh.f32 %v1783_v11 }
0x2872   :  { %v2602_v57 = vpop.eup %2601 }
0x2873   :  { %1786 = vrot.lane.b32.xlu0 %v2602_v57, %s2689_s25 }
0x28e5   :  { %v1787_v58 = vpop.permute.xlu0 %1786 }
0x28e6   :  { %v1789_v59 = vmul.f32 %v2600_v53, %v1787_v58 }
0x28e8   :  { %1792 = vrot.lane.b32.xlu1 %v1789_v59, %s2690_s3 }
0x295a   :  { %v1793_v60 = vpop.permute.xlu1 %1792 }
0x295b   :  { %2348 = vmatmul.mubr.msk.f32.vlgmr.msra.gmra.mrb[16].mxu1 %vm156_vm4, %v1793_v60 }
0x2a2e   :  { %v1862_v62 = vpop.f32.mrb[16].mxu1 }
0x2a2f   :  { %v1866_v63 = vadd.f32 %v1862_v62, %v1790_v61  ;;  %v2349_v0 = vpop.f32.mrb[17].mxu1 }
0x2a31   :  { %2603 = vtanh.f32 %v1866_v63  ;;  %v2061_v4 = vmul.f32 -1.442695, %v1866_v63 }
0x2a33   :  { %2605 = vpow2.f32 %v2061_v4 }
0x2a3b   :  { %v2604_v3 = vpop.eup %2603 }
0x2a3c   :  { %1876 = vrot.lane.b32.xlu0 %v2604_v3, %s2689_s25 }
0x2a3d   :  { %v2606_v5 = vpop.eup %2605 }
0x2a3e   :  { %v1870_v6 = vadd.f32 1.0, %v2606_v5 }
0x2a40   :  { %2607 = vrcp.f32 %v1870_v6 }
0x2a4a   :  { %v2608_v7 = vpop.eup %2607 }
0x2a4b   :  { %v1874_v12 = vmul.f32 %v2608_v7, %v1783_v11 }
0x2aae   :  { %v1877_v8 = vpop.permute.xlu0 %1876 }
0x2aaf   :  { %v1879_v10 = vmul.f32 %v2608_v7, %v1877_v8 }
0x2ab1   :  { %1881 = vrot.lane.b32.xlu1 %v1879_v10, %s2690_s3 }
0x2b23   :  { %v1882_v13 = vpop.permute.xlu1 %1881 }
0x2b24   :  { %v1884_v14 = vadd.f32 %v1882_v13, %v1874_v12 }
0x2b26   :  { %2609 = vtanh.f32 %v1884_v14 }
0x2b30   :  { %v2610_v21 = vpop.eup %2609 }
0x2b31   :  { %1887 = vrot.lane.b32.xlu0 %v2610_v21, %s2689_s25 }
0x2b35   :  { %984 = vrot.lane.b32.xlu0 %v2895_v35, %s2691_s21 }
0x2ba3   :  { %v1888_v22 = vpop.permute.xlu0 %1887 }
0x2ba4   :  { %v1890_v23 = vmul.f32 %v2608_v7, %v1888_v22 }
0x2ba6   :  { %1892 = vrot.lane.b32.xlu1 %v1890_v23, %s2690_s3 }
0x2ba7   :  { %v985_v24 = vpop.permute.xlu0 %984 }
0x2ba8   :  { %987 = vst.msk [vmem:[#allocation9] sm:$0x3] %vm259_vm3, %v985_v24 }
0x2baa   :  { %1898 = vrot.lane.b32.xlu1 %v1884_v14, %s2691_s21 }
0x2c18   :  { %v1893_v25 = vpop.permute.xlu1 %1892 }
0x2c19   :  { %1896 = vst.msk [vmem:[#allocation8 + $0x2] sm:$0x3] %vm259_vm3, %v1893_v25  ;;  %2359 = vmatmul.mubr.msk.f32.vlgmr.msra.gmra.mrb[18].mxu0 %vm156_vm4, %v1893_v25 }
0x2c1c   :  { %v1899_v1 = vpop.permute.xlu1 %1898 }
0x2c1d   :  { %1902 = vst.msk [vmem:[#allocation9 + $0x2] sm:$0x3] %vm259_vm3, %v1899_v1 }
0x2c1e   :  { %2644 = shalt.err (!%p2641_p12)
}
0x2c1f   :  { %s2645_s25 = scalar_lea.hbm %s3069_s10, 64 }
0x2c20   :  { %p2646_p13 = scmp.ne.s32.totalorder %s3069_s10, %s2645_s25  ;;  %p2649_p0 = scmp.lt.u32.totalorder %s2645_s25, %s3069_s10 }
0x2c22   :  { %p2651_p1 = pnand %p2649_p0, %p2646_p13 }
0x2c24   :  { %2654 = shalt.err (!%p2651_p1)
}
0x2c25   :  { %s2694_s29 = smov 2   ;;  %s2655_s13 = scalar_lea.vmem %s2008_s23, 64 }
0x2c26   :  { %2001 = dma.vmem_to_hbm [thread:$0]  %s1996_s22, 64, %s3069_s10, [#allocation7], %s2690_s3, %s2690_s3, %s2694_s29  }
0x2c27   :  { %p2656_p2 = scmp.ne.s32.totalorder %s2008_s23, %s2655_s13  ;;  %p2660_p3 = scmp.lt.s32.totalorder %s2008_s23, %s2008_s23 }
0x2c28   :  { %p2661_p4 = scmp.lt.s32.totalorder %s2655_s13, %s2655_s13 }
0x2c2a   :  { %p2662_p5 = por %p2661_p4, %p2660_p3 }
0x2c2c   :  { %p2663_p6 = pnand %p2662_p5, %p2656_p2 }
0x2c2e   :  { %2666 = shalt.err (!%p2663_p6)
}
0x2c2f   :  { %s2667_s6 = scalar_lea.hbm %s3070_s11, 64 }
0x2c30   :  { %p2668_p7 = scmp.ne.s32.totalorder %s3070_s11, %s2667_s6  ;;  %p2671_p8 = scmp.lt.u32.totalorder %s2667_s6, %s3070_s11 }
0x2c32   :  { %p2673_p9 = pnand %p2671_p8, %p2668_p7 }
0x2c34   :  { %2676 = shalt.err (!%p2673_p9)
}
0x2c35   :  { %2013 = dma.vmem_to_hbm [thread:$0]  %s2008_s23, 64, %s3070_s11, [#allocation10], %s2690_s3, %s2690_s3, %s2694_s29   ;;  %v2062_v35 = vld [vmem:[#allocation4] ss:$0 sm:$0xff]  ;;  %vm1986_vm5 = vcmask 1024  }
0x2cec   :  { %v1982_v26 = vpop.f32.mrb[18].mxu0 }
0x2ced   :  { %v1983_v27 = vadd.f32 %v2062_v35, %v1982_v26  ;;  %v2360_v28 = vpop.f32.mrb[19].mxu0 }
0x2cef   :  { %1987 = vst.msk [vmem:[%s3068_s9] sm:$0x3] %vm1986_vm5, %v1983_v27 }
0x2cf0   :  { %2679 = dma.done.wait [#allocation7], 64  }
0x2cf1   :  { %2680 = vsyncadd [#allocation7], 4294967232 }
0x2cf2   :  { %2681 = dma.done.wait [#allocation10], 64  }
0x2cf3   :  { %2682 = vsyncadd [#allocation10], 4294967232 }
0x2cf4   :  { %2022 = vsyncpa [#allocation6], 1 }
0x2cf5   :  { %2023 = vsyncpa [#allocation7], 1 }
0x2cf6   :  { %2024 = vsyncpa [#allocation10], 1 }

</bundles_post_ra>
